<compile_context>
chip_gen: v7x
topology: tpu7x:2x2x1
jax: 0.10.0
libtpu: 0.0.40
codegen_flags: <defaults>
</compile_context>

<pallas_src>
import functools

import numpy as np
import jax
import jax.numpy as jnp
from jax import lax
from jax.experimental import pallas as pl
from jax.experimental.pallas import tpu as pltpu


# ----------------------------------------------------------------------------
# helpers
# ----------------------------------------------------------------------------

PATCH = 4                       # backbone patch size -> feature map is (H/4, W/4)
_VMEM_FALLBACK = 32 * 1024 * 1024
_vmem_cache = []


def _round_up(x, m):
    return ((x + m - 1) // m) * m


def _vmem_limit_bytes():
    """Generation-aware scoped-VMEM budget: ~75% of physical, 32 MiB fallback."""
    if _vmem_cache:
        return _vmem_cache[0]
    limit = _VMEM_FALLBACK
    try:
        cap = getattr(pltpu.get_tpu_info(), "vmem_capacity_bytes", None)
        if cap:
            limit = int(cap) * 3 // 4      # ~96 MiB v5e/v6e, ~48 MiB v7x
    except Exception:
        pass
    _vmem_cache.append(limit)
    return limit


def _erf(x, *, in_kernel=False):
    # Abramowitz & Stegun 7.1.26, |err| < 1.5e-7.  Inside kernels the divide is an
    # approx reciprocal on the EUP slot (frees the VALU); outside (reference) a plain
    # divide is used.
    a1, a2, a3, a4, a5 = 0.254829592, -0.284496736, 1.421413741, -1.453152027, 1.061405429
    p = 0.3275911
    s = jnp.where(x >= 0.0, 1.0, -1.0)
    z = jnp.abs(x)
    den = 1.0 + p * z
    t = pl.reciprocal(den, approx=True) if in_kernel else 1.0 / den
    poly = t * (a1 + t * (a2 + t * (a3 + t * (a4 + t * a5))))
    return s * (1.0 - poly * jnp.exp(-z * z))


def _gelu_exact(x, *, in_kernel=False):
    # Matches PyTorch nn.GELU() (exact erf form).
    return 0.5 * x * (1.0 + _erf(x * 0.7071067811865476, in_kernel=in_kernel))


def _tile_for(n, cap, align, min_tile=None):
    """Pick (padded_n, tile): tile | padded_n, layout-legal, no padding if avoidable."""
    if n <= cap:
        return n, n                               # full-extent block is always legal
    floor = min_tile if min_tile is not None else align
    t = (cap // align) * align
    while t >= floor:
        if n % t == 0:
            return n, t
        t -= align
    t = (cap // align) * align
    return _round_up(n, t), t


def _spatial_tiling(hw):
    """Pick (HWp, tm) so tm | HWp, the block is layout-legal, and HWp == hw whenever possible."""
    if hw % 8 == 0:
        for tm in (512, 384, 256, 128):
            if hw % tm == 0:
                return hw, tm
        if hw <= 1024:
            return hw, hw
    tm = 256 if hw > 256 else _round_up(hw, 8)
    return _round_up(hw, tm), tm


def _lane_tile(n, cap=512):
    for t in (512, 384, 256, 128):
        if t <= cap and n % t == 0:
            return t
    return min(n, 128)


# ----------------------------------------------------------------------------
# Kernel 1: generic tiled matmul + bias (+ exact GELU)  [patch embedding]
# ----------------------------------------------------------------------------

def _matmul_kernel(x_ref, w_ref, b_ref, o_ref, acc_ref, *, act):
    k = pl.program_id(2)

    @pl.when(k == 0)
    def _():
        acc_ref[...] = jnp.zeros_like(acc_ref)

    acc_ref[...] += jnp.dot(x_ref[...], w_ref[...],
                            preferred_element_type=jnp.float32)

    @pl.when(k == pl.num_programs(2) - 1)
    def _():
        y = acc_ref[...] + b_ref[...]
        if act:
            y = _gelu_exact(y, in_kernel=True)
        o_ref[...] = y.astype(o_ref.dtype)


def matmul_bias(x, w, b, *, act=False, out_dtype=jnp.bfloat16,
                tm_cap=1024, tn_cap=512, tk_cap=512):
    """Tiled y = act(x @ w + b).  bf16 MXU inputs, f32 accumulator, f32 epilogue."""
    M, K = x.shape
    K2, N = w.shape
    assert K == K2
    Mp, tm = _tile_for(M, tm_cap, 8, min_tile=128)
    Kp, tk = _tile_for(K, tk_cap, 128)
    Np, tn = _tile_for(N, tn_cap, 128)

    xp = jnp.pad(x.astype(jnp.bfloat16), ((0, Mp - M), (0, Kp - K)))
    wp = jnp.pad(w.astype(jnp.bfloat16), ((0, Kp - K), (0, Np - N)))
    bp = jnp.pad(b.reshape(1, -1).astype(jnp.float32), ((0, 0), (0, Np - N)))

    grid = (Mp // tm, Np // tn, Kp // tk)
    out = pl.pallas_call(
        functools.partial(_matmul_kernel, act=act),
        grid=grid,
        in_specs=[
            pl.BlockSpec((tm, tk), lambda i, j, k: (i, k)),
            pl.BlockSpec((tk, tn), lambda i, j, k: (k, j)),
            pl.BlockSpec((1, tn), lambda i, j, k: (0, j)),
        ],
        out_specs=pl.BlockSpec((tm, tn), lambda i, j, k: (i, j)),
        out_shape=jax.ShapeDtypeStruct((Mp, Np), out_dtype),
        scratch_shapes=[pltpu.VMEM((tm, tn), jnp.float32)],
        compiler_params=pltpu.CompilerParams(
            dimension_semantics=("parallel", "parallel", "arbitrary"),
            vmem_limit_bytes=_vmem_limit_bytes()),
        cost_estimate=pl.CostEstimate(
            flops=2 * Mp * Np * Kp,
            transcendentals=Mp * Np if act else 0,
            bytes_accessed=Mp * Kp * 2 + Kp * Np * 2 + Np * 4 + Mp * Np * 2),
    )(xp, wp, bp)
    if Mp != M or Np != N:
        out = out[:M, :N]
    return out


# ----------------------------------------------------------------------------
# Kernel 2: FUSED task projection + GELU + spatial-mean partials + 1x1-conv heads
#           (the (B, HW, T*D) task-feature tensor never touches HBM)
# ----------------------------------------------------------------------------

def _fused_proj_head_kernel(x_ref, tw_ref, tb_ref, wh_ref, bh_ref,
                            o_ref, ms_ref, acc_ref, *, hw, tm):
    i = pl.program_id(1)                       # spatial tile
    j = pl.program_id(2)                       # task-feature (TDp) tile, innermost
    n_j = pl.num_programs(2)

    # --- stacked task projection + exact GELU (f32 epilogue) -----------------
    y = jnp.dot(x_ref[0], tw_ref[...], preferred_element_type=jnp.float32)
    y = _gelu_exact(y + tb_ref[...], in_kernel=True)

    # mask padded spatial rows (they would otherwise hold gelu(bias) junk)
    rows = i * tm + lax.broadcasted_iota(jnp.int32, (tm, 1), 0)
    row_ok = rows < hw
    ym = jnp.where(row_ok, y, 0.0)

    # --- spatial-mean partial row-sums (tiny; reduced + scaled by 1/hw outside) --
    ms_ref[...] = jnp.sum(ym, axis=0, keepdims=True)[None]

    # --- fused heads: f32 accumulation over the TDp axis ----------------------
    @pl.when(j == 0)
    def _():
        acc_ref[...] = jnp.zeros_like(acc_ref)

    acc_ref[...] += jnp.dot(ym.astype(jnp.bfloat16), wh_ref[...],
                            preferred_element_type=jnp.float32)

    @pl.when(j == n_j - 1)
    def _():
        hout = jnp.where(row_ok, acc_ref[...] + bh_ref[...], 0.0)
        o_ref[0] = hout.T.astype(o_ref.dtype)   # per-tile transpose -> channels-first


def fused_task_heads(shared, task_w, task_b, head_w, head_b, *, hw, tm):
    """shared (B, HWp, Dp) bf16 -> heads (B, Cp, HWp) bf16 (channels-first) and
    per-task spatial means (B, TDp) f32, without materializing task features."""
    B, HWp, Dp = shared.shape
    _, TDp = task_w.shape
    _, Cp = head_w.shape
    tn = _lane_tile(TDp)
    n_i = HWp // tm
    grid = (B, n_i, TDp // tn)

    heads, partial = pl.pallas_call(
        functools.partial(_fused_proj_head_kernel, hw=hw, tm=tm),
        grid=grid,
        in_specs=[
            pl.BlockSpec((1, tm, Dp), lambda b, i, j: (b, i, 0)),
            pl.BlockSpec((Dp, tn), lambda b, i, j: (0, j)),
            pl.BlockSpec((1, tn), lambda b, i, j: (0, j)),
            pl.BlockSpec((tn, Cp), lambda b, i, j: (j, 0)),
            pl.BlockSpec((1, Cp), lambda b, i, j: (0, 0)),
        ],
        out_specs=[
            pl.BlockSpec((1, Cp, tm), lambda b, i, j: (b, 0, i)),
            pl.BlockSpec((1, 1, tn), lambda b, i, j: (b, i, j)),
        ],
        out_shape=[
            jax.ShapeDtypeStruct((B, Cp, HWp), jnp.bfloat16),
            jax.ShapeDtypeStruct((B, n_i, TDp), jnp.float32),
        ],
        scratch_shapes=[pltpu.VMEM((tm, Cp), jnp.float32)],
        compiler_params=pltpu.CompilerParams(
            dimension_semantics=("parallel", "parallel", "arbitrary"),
            vmem_limit_bytes=_vmem_limit_bytes()),
        cost_estimate=pl.CostEstimate(
            flops=2 * B * HWp * TDp * (Dp + Cp),
            transcendentals=B * HWp * TDp,
            bytes_accessed=(B * HWp * Dp * 2 + Dp * TDp * 2 + TDp * Cp * 2
                            + B * Cp * HWp * 2 + B * n_i * TDp * 4)),
    )(shared, task_w, task_b, head_w, head_b)

    means = jnp.sum(partial, axis=1) * (1.0 / hw)     # (B, TDp): tiny XLA reduce
    return heads, means


# ----------------------------------------------------------------------------
# Kernel 3: bilinear resize (align_corners=False), channel- and row-tiled NCHW
# ----------------------------------------------------------------------------

def _bilinear_matrix(out_size, in_size):
    """Interpolation matrix matching torch F.interpolate(bilinear, align_corners=False)."""
    if out_size == in_size:
        return jnp.eye(out_size, dtype=jnp.float32)
    scale = in_size / out_size
    o = np.arange(out_size)
    src = np.clip((o + 0.5) * scale - 0.5, 0.0, None)
    i0 = np.minimum(np.floor(src).astype(np.int64), in_size - 1)
    i1 = np.minimum(i0 + 1, in_size - 1)
    w1 = (src - i0).astype(np.float32)
    w0 = 1.0 - w1
    M = np.zeros((out_size, in_size), dtype=np.float32)
    M[o, i0] += w0
    M[o, i1] += w1
    return jnp.asarray(M)


def _resize_kernel(rh_ref, x_ref, rwt_ref, o_ref, xw_ref, *, c_tile, h, merge_w):
    r = pl.program_id(2)

    # W pass once per (batch, channel-tile); cached in VMEM scratch, reused for all
    # output-row tiles r (the x block's index_map is constant in r, so it also stays
    # resident in VMEM).
    @pl.when(r == 0)
    def _():
        rwt = rwt_ref[...]
        if merge_w:
            xt = x_ref[0].reshape(c_tile * h, -1)            # one big lane-dense matmul
            xw_ref[...] = jnp.dot(xt, rwt,
                                  preferred_element_type=jnp.float32).astype(xw_ref.dtype)
        else:                                                # small-h fallback (layout-safe)
            for c in range(c_tile):
                xw_ref[c * h:(c + 1) * h, :] = jnp.dot(
                    x_ref[0, c], rwt,
                    preferred_element_type=jnp.float32).astype(xw_ref.dtype)

    rh = rh_ref[...]
    for c in range(c_tile):
        o_ref[0, c] = jnp.dot(rh, xw_ref[c * h:(c + 1) * h, :],
                              preferred_element_type=jnp.float32).astype(o_ref.dtype)


def bilinear_resize_nchw(x, out_hw):
    """x: (B, C, h, w) bf16 -> (B, C, H_out, W_out) f32, bilinear, align_corners=False."""
    B, C, h, w = x.shape
    H, W = out_hw
    budget = _vmem_limit_bytes()

    th = H
    for cand in (256, 128, 64, 32, 16, 8):
        if H % cand == 0:
            th = cand
            break

    c_tile = min(8, C)
    while c_tile > 1:
        vm = (2 * c_tile * th * W * 4          # double-buffered f32 output block
              + 2 * c_tile * h * w * 2         # double-buffered bf16 input block
              + c_tile * h * W * 2             # bf16 W-pass scratch
              + 2 * (th * h + w * W) * 2)      # interpolation-matrix blocks
        if vm <= budget // 2:
            break
        c_tile //= 2
    assert C % c_tile == 0

    rh = _bilinear_matrix(H, h).astype(jnp.bfloat16)          # (H, h)
    rwt = _bilinear_matrix(W, w).T.astype(jnp.bfloat16)       # (w, W)

    return pl.pallas_call(
        functools.partial(_resize_kernel, c_tile=c_tile, h=h, merge_w=(h % 8 == 0)),
        grid=(B, C // c_tile, H // th),
        in_specs=[
            pl.BlockSpec((th, h), lambda b, c, r: (r, 0)),
            pl.BlockSpec((1, c_tile, h, w), lambda b, c, r: (b, c, 0, 0)),
            pl.BlockSpec((w, W), lambda b, c, r: (0, 0)),
        ],
        out_specs=pl.BlockSpec((1, c_tile, th, W), lambda b, c, r: (b, c, r, 0)),
        out_shape=jax.ShapeDtypeStruct((B, C, H, W), jnp.float32),
        scratch_shapes=[pltpu.VMEM((c_tile * h, W), jnp.bfloat16)],
        compiler_params=pltpu.CompilerParams(
            dimension_semantics=("parallel", "parallel", "arbitrary"),
            vmem_limit_bytes=_vmem_limit_bytes()),
        cost_estimate=pl.CostEstimate(
            flops=2 * B * C * (h * w * W + H * h * W), transcendentals=0,
            bytes_accessed=B * C * (h * w * 2 + H * W * 4) + (H * h + w * W) * 2),
    )(rh, x.astype(jnp.bfloat16), rwt)


# ----------------------------------------------------------------------------
# Synthetic TaskPrompter backbone + heads (external modules in the original code)
# ----------------------------------------------------------------------------

def init_params(key, in_chans, embed_dim, tasks, head_channels):
    keys = jax.random.split(key, 3 + 4 * len(tasks))
    k = iter(keys)
    params = {
        'embed_w': 0.1 * jax.random.normal(next(k), (in_chans * PATCH * PATCH, embed_dim), jnp.float32),
        'embed_b': 0.05 * jax.random.normal(next(k), (embed_dim,), jnp.float32),
        'prompts': 0.1 * jax.random.normal(next(k), (len(tasks), embed_dim), jnp.float32),
        'task_w': {}, 'task_b': {}, 'head_w': {}, 'head_b': {},
    }
    for t in tasks:
        params['task_w'][t] = 0.1 * jax.random.normal(next(k), (embed_dim, embed_dim), jnp.float32)
        params['task_b'][t] = 0.05 * jax.random.normal(next(k), (embed_dim,), jnp.float32)
        params['head_w'][t] = 0.1 * jax.random.normal(next(k), (embed_dim, head_channels[t]), jnp.float32)
        params['head_b'][t] = 0.05 * jax.random.normal(next(k), (head_channels[t],), jnp.float32)
    return params


# ----------------------------------------------------------------------------
# Wrapper (mirrors TaskPrompterWrapper.forward)
# ----------------------------------------------------------------------------

class TaskPrompterWrapperPallas:
    def __init__(self, tasks, params, head_channels, target_size=None):
        self.tasks = tuple(tasks)
        self.head_channels = dict(head_channels)
        self.target_size = target_size   # p.dd_label_map_size if present, else None

        self.D = int(params['embed_w'].shape[1])
        self.CPP = int(params['embed_w'].shape[0])
        T = len(self.tasks)
        self.Kp = _round_up(self.CPP, 128)
        self.Dp = _round_up(self.D, 128)
        self.TDp = _round_up(T * self.D, 128)
        c_total = sum(self.head_channels[t] for t in self.tasks)
        # Cp is the SUBLANE dim of the channels-first head output (lane dim is the
        # spatial tile), so a multiple of 8 is sufficient -- no need to pad to 128.
        self.Cp = _round_up(c_total, 8)

        self.pp = self._pack_params(params)
        self._fwd = jax.jit(self._forward)

    def _pack_params(self, params):
        """Zero-pad to lane-aligned dims; stack per-task projection + head weights."""
        D = self.D
        ew = np.zeros((self.Kp, self.Dp), np.float32)
        ew[:self.CPP, :D] = np.asarray(params['embed_w'], np.float32)
        eb = np.zeros((1, self.Dp), np.float32)
        eb[0, :D] = np.asarray(params['embed_b'], np.float32)
        wt = np.zeros((self.Dp, self.TDp), np.float32)
        bt = np.zeros((1, self.TDp), np.float32)
        wh = np.zeros((self.TDp, self.Cp), np.float32)   # block-diagonal stacked heads
        bh = np.zeros((1, self.Cp), np.float32)
        self.ch_offsets = {}
        off = 0
        for ti, t in enumerate(self.tasks):
            wt[:D, ti * D:(ti + 1) * D] = np.asarray(params['task_w'][t], np.float32)
            bt[0, ti * D:(ti + 1) * D] = np.asarray(params['task_b'][t], np.float32)
            c = self.head_channels[t]
            wh[ti * D:(ti + 1) * D, off:off + c] = np.asarray(params['head_w'][t], np.float32)
            bh[0, off:off + c] = np.asarray(params['head_b'][t], np.float32)
            self.ch_offsets[t] = off
            off += c
        return {
            'embed_w': jnp.asarray(ew, jnp.bfloat16),
            'embed_b': jnp.asarray(eb, jnp.float32),
            'task_w': jnp.asarray(wt, jnp.bfloat16),
            'task_b': jnp.asarray(bt, jnp.float32),
            'head_w': jnp.asarray(wh, jnp.bfloat16),
            'head_b': jnp.asarray(bh, jnp.float32),
            'prompts': jnp.asarray(params['prompts'], jnp.float32),
        }

    def _forward(self, pp, x):
        B, C_in, H, W = x.shape
        h, w = H // PATCH, W // PATCH
        hw = h * w
        HWp, tm_sp = _spatial_tiling(hw)
        target = self.target_size if self.target_size is not None else (H, W)

        # patchify: pure layout op, folded into the same jit so XLA fuses it with the
        # embed matmul's input pipeline.
        patches = (x.reshape(B, C_in, h, PATCH, w, PATCH)
                    .transpose(0, 2, 4, 1, 3, 5)
                    .reshape(B, hw, self.CPP))
        patches = jnp.pad(patches, ((0, 0), (0, HWp - hw), (0, self.Kp - self.CPP)))
        patches = patches.astype(jnp.bfloat16)

        # patch embedding: tiled bf16 MXU matmul + exact GELU
        shared = matmul_bias(patches.reshape(B * HWp, self.Kp),
                             pp['embed_w'], pp['embed_b'],
                             act=True, out_dtype=jnp.bfloat16)
        shared = shared.reshape(B, HWp, self.Dp)

        # fused: all task projections + GELU + spatial-mean partials + all heads,
        # emitted channels-first; the (B, HW, T*D) feature tensor never hits HBM.
        heads, means = fused_task_heads(shared, pp['task_w'], pp['task_b'],
                                        pp['head_w'], pp['head_b'],
                                        hw=hw, tm=tm_sp)
        if HWp != hw:                               # only when hw is not 8-aligned
            heads = heads[:, :, :hw]
        heads = heads.reshape(B, self.Cp, h, w)     # free row-major reshape

        # F.interpolate(mode='bilinear', align_corners=False)
        resized = bilinear_resize_nchw(heads, tuple(target))

        D = self.D
        out = {}
        for t in self.tasks:
            c0 = self.ch_offsets[t]
            out[t] = resized[:, c0:c0 + self.head_channels[t]]
        out['task_mus'] = {t: means[:, ti * D:(ti + 1) * D]
                           for ti, t in enumerate(self.tasks)}
        out['task_prompts'] = pp['prompts']
        return out

    def __call__(self, x):
        return self._fwd(self.pp, x)


# ----------------------------------------------------------------------------
# Pure-JAX reference (same math, f32, no Pallas) for a numerical sanity check
# ----------------------------------------------------------------------------

def reference_forward(params, x, tasks, head_channels, target_size=None):
    B, C_in, H, W = x.shape
    h, w = H // PATCH, W // PATCH
    hw = h * w
    patches = (x.reshape(B, C_in, h, PATCH, w, PATCH)
                .transpose(0, 2, 4, 1, 3, 5)
                .reshape(B, hw, C_in * PATCH * PATCH))
    shared = _gelu_exact(patches @ params['embed_w'] + params['embed_b'])
    target = target_size if target_size is not None else (H, W)
    rh = _bilinear_matrix(target[0], h)
    rw = _bilinear_matrix(target[1], w)
    out, mus = {}, {}
    for t in tasks:
        tf = _gelu_exact(shared @ params['task_w'][t] + params['task_b'][t])
        mus[t] = tf.mean(axis=1)
        y = tf @ params['head_w'][t] + params['head_b'][t]
        y = y.reshape(B, h, w, -1).transpose(0, 3, 1, 2)
        out[t] = jnp.einsum('Hh,bchw,wW->bcHW', rh, y, rw.T)
    return out, mus


# ----------------------------------------------------------------------------

if __name__ == "__main__":
    B, C_in, H, W = 2, 4, 16, 16
    D = 32
    tasks = ('semseg', 'depth')
    head_channels = {'semseg': 5, 'depth': 1}

    key = jax.random.PRNGKey(0)
    k_x, k_p = jax.random.split(key)
    x = jax.random.normal(k_x, (B, C_in, H, W), jnp.float32)

    params = init_params(k_p, C_in, D, tasks, head_channels)
    model = TaskPrompterWrapperPallas(tasks, params, head_channels, target_size=None)

    out = model(x)
    out = jax.tree_util.tree_map(lambda a: a.block_until_ready(), out)

    assert out['semseg'].shape == (B, head_channels['semseg'], H, W)
    assert out['depth'].shape == (B, head_channels['depth'], H, W)
    assert out['task_mus']['semseg'].shape == (B, D)
    assert out['task_mus']['depth'].shape == (B, D)
    assert out['task_prompts'].shape == (len(tasks), D)

    # sanity check against the f32 pure-JAX reference (loose tol: kernels run bf16 MXU)
    ref_out, ref_mus = reference_forward(params, x, tasks, head_channels, target_size=None)
    for t in tasks:
        err = float(jnp.max(jnp.abs(out[t].astype(jnp.float32) - ref_out[t])))
        merr = float(jnp.max(jnp.abs(out['task_mus'][t].astype(jnp.float32) - ref_mus[t])))
        assert err < 0.1, f"{t}: max abs err {err}"
        assert merr < 0.1, f"{t}: mean max abs err {merr}"

    print("KERNEL_OK")
</pallas_src>

<mosaic_0001>
module attributes {stable_mosaic.version = 11 : i64} {
  func.func @_matmul_kernel(%arg0: i32, %arg1: i32, %arg2: i32, %arg3: memref<32x128xbf16, #tpu.memory_space<vmem>>, %arg4: memref<128x128xbf16, #tpu.memory_space<vmem>>, %arg5: memref<1x128xf32, #tpu.memory_space<vmem>>, %arg6: memref<32x128xbf16, #tpu.memory_space<vmem>>, %arg7: memref<32x128xf32, #tpu.memory_space<vmem>>) attributes {dimension_semantics = [#tpu.dimension_semantics<parallel>, #tpu.dimension_semantics<parallel>, #tpu.dimension_semantics<arbitrary>], iteration_bounds = array<i64: 1, 1, 1>, scalar_prefetch = 0 : i64, scratch_operands = 1 : i64, tpu.core_type = #tpu.core_type<tc>, window_params = [{transform_indices = @transform_0, window_bounds = array<i64: 32, 128>}, {transform_indices = @transform_1, window_bounds = array<i64: 128, 128>}, {transform_indices = @transform_2, window_bounds = array<i64: 1, 128>}, {transform_indices = @transform_3, window_bounds = array<i64: 32, 128>}]} {
    %c0_i32 = arith.constant 0 : i32
    %0 = arith.cmpi eq, %arg2, %c0_i32 : i32
    %1 = arith.extui %0 : i1 to i32
    %c0_i32_0 = arith.constant 0 : i32
    %2 = arith.cmpi ne, %1, %c0_i32_0 : i32
    scf.if %2 {
      %cst_10 = arith.constant 0.000000e+00 : f32
      %12 = vector.broadcast %cst_10 : f32 to vector<32x128xf32>
      %c0_11 = arith.constant 0 : index
      %c0_12 = arith.constant 0 : index
      %13 = vector.load %arg7[%c0_11, %c0_12] : memref<32x128xf32, #tpu.memory_space<vmem>>, vector<32x128xf32>
      tpu.vector_store %arg7[%c0_11, %c0_12], %12 {strides = array<i32>} : memref<32x128xf32, #tpu.memory_space<vmem>>, vector<32x128xf32>,
    } else {
    }
    %c0 = arith.constant 0 : index
    %c0_1 = arith.constant 0 : index
    %3 = vector.load %arg7[%c0, %c0_1] : memref<32x128xf32, #tpu.memory_space<vmem>>, vector<32x128xf32>
    %c0_2 = arith.constant 0 : index
    %c0_3 = arith.constant 0 : index
    %4 = vector.load %arg3[%c0_2, %c0_3] : memref<32x128xbf16, #tpu.memory_space<vmem>>, vector<32x128xbf16>
    %c0_4 = arith.constant 0 : index
    %c0_5 = arith.constant 0 : index
    %5 = vector.load %arg4[%c0_4, %c0_5] : memref<128x128xbf16, #tpu.memory_space<vmem>>, vector<128x128xbf16>
    %cst = arith.constant dense<0.000000e+00> : vector<32x128xf32>
    %6 = tpu.matmul %4, %5, %cst {dimension_numbers = #tpu.dot_dimension_numbers<[1], [0], [0], [1], [0, 0, 1, 1], [], []>} : vector<32x128xbf16>, vector<128x128xbf16>, vector<32x128xf32> -> vector<32x128xf32>
    %7 = arith.addf %3, %6 : vector<32x128xf32>
    %c0_6 = arith.constant 0 : index
    %c0_7 = arith.constant 0 : index
    %8 = vector.load %arg7[%c0_6, %c0_7] : memref<32x128xf32, #tpu.memory_space<vmem>>, vector<32x128xf32>
    tpu.vector_store %arg7[%c0_6, %c0_7], %7 {strides = array<i32>} : memref<32x128xf32, #tpu.memory_space<vmem>>, vector<32x128xf32>,
    %c0_i32_8 = arith.constant 0 : i32
    %9 = arith.cmpi eq, %arg2, %c0_i32_8 : i32
    %10 = arith.extui %9 : i1 to i32
    %c0_i32_9 = arith.constant 0 : i32
    %11 = arith.cmpi ne, %10, %c0_i32_9 : i32
    scf.if %11 {
      %c0_10 = arith.constant 0 : index
      %c0_11 = arith.constant 0 : index
      %12 = vector.load %arg7[%c0_10, %c0_11] : memref<32x128xf32, #tpu.memory_space<vmem>>, vector<32x128xf32>
      %c0_12 = arith.constant 0 : index
      %c0_13 = arith.constant 0 : index
      %13 = vector.load %arg5[%c0_12, %c0_13] : memref<1x128xf32, #tpu.memory_space<vmem>>, vector<1x128xf32>
      %14 = vector.broadcast %13 : vector<1x128xf32> to vector<32x128xf32>
      %15 = arith.addf %12, %14 : vector<32x128xf32>
      %cst_14 = arith.constant 5.000000e-01 : f32
      %16 = vector.broadcast %cst_14 : f32 to vector<32x128xf32>
      %17 = arith.mulf %16, %15 : vector<32x128xf32>
      %cst_15 = arith.constant 0.707106769 : f32
      %18 = vector.broadcast %cst_15 : f32 to vector<32x128xf32>
      %19 = arith.mulf %15, %18 : vector<32x128xf32>
      %cst_16 = arith.constant 0.000000e+00 : f32
      %20 = vector.broadcast %cst_16 : f32 to vector<32x128xf32>
      %21 = arith.cmpf oge, %19, %20 : vector<32x128xf32>
      %cst_17 = arith.constant 1.000000e+00 : f32
      %cst_18 = arith.constant -1.000000e+00 : f32
      %22 = vector.broadcast %cst_17 : f32 to vector<32x128xf32>
      %23 = vector.broadcast %cst_18 : f32 to vector<32x128xf32>
      %24 = arith.select %21, %22, %23 : vector<32x128xi1>, vector<32x128xf32>
      %25 = math.absf %19 : vector<32x128xf32>
      %cst_19 = arith.constant 0.327591091 : f32
      %26 = vector.broadcast %cst_19 : f32 to vector<32x128xf32>
      %27 = arith.mulf %26, %25 : vector<32x128xf32>
      %cst_20 = arith.constant 1.000000e+00 : f32
      %28 = vector.broadcast %cst_20 : f32 to vector<32x128xf32>
      %29 = arith.addf %28, %27 : vector<32x128xf32>
      %30 = tpu.reciprocal %29 {approx = true} : vector<32x128xf32> -> vector<32x128xf32>
      %cst_21 = arith.constant 1.06140542 : f32
      %31 = vector.broadcast %cst_21 : f32 to vector<32x128xf32>
      %32 = arith.mulf %30, %31 : vector<32x128xf32>
      %cst_22 = arith.constant -1.45315206 : f32
      %33 = vector.broadcast %cst_22 : f32 to vector<32x128xf32>
      %34 = arith.addf %33, %32 : vector<32x128xf32>
      %35 = arith.mulf %30, %34 : vector<32x128xf32>
      %cst_23 = arith.constant 1.42141378 : f32
      %36 = vector.broadcast %cst_23 : f32 to vector<32x128xf32>
      %37 = arith.addf %36, %35 : vector<32x128xf32>
      %38 = arith.mulf %30, %37 : vector<32x128xf32>
      %cst_24 = arith.constant -0.284496725 : f32
      %39 = vector.broadcast %cst_24 : f32 to vector<32x128xf32>
      %40 = arith.addf %39, %38 : vector<32x128xf32>
      %41 = arith.mulf %30, %40 : vector<32x128xf32>
      %cst_25 = arith.constant 0.254829586 : f32
      %42 = vector.broadcast %cst_25 : f32 to vector<32x128xf32>
      %43 = arith.addf %42, %41 : vector<32x128xf32>
      %44 = arith.mulf %30, %43 : vector<32x128xf32>
      %cst_26 = arith.constant 0.000000e+00 : f32
      %45 = vector.broadcast %cst_26 : f32 to vector<32x128xf32>
      %46 = arith.subf %45, %25 : vector<32x128xf32>
      %47 = arith.mulf %46, %25 : vector<32x128xf32>
      %48 = math.exp %47 : vector<32x128xf32>
      %49 = arith.mulf %44, %48 : vector<32x128xf32>
      %cst_27 = arith.constant 1.000000e+00 : f32
      %50 = vector.broadcast %cst_27 : f32 to vector<32x128xf32>
      %51 = arith.subf %50, %49 : vector<32x128xf32>
      %52 = arith.mulf %24, %51 : vector<32x128xf32>
      %cst_28 = arith.constant 1.000000e+00 : f32
      %53 = vector.broadcast %cst_28 : f32 to vector<32x128xf32>
      %54 = arith.addf %53, %52 : vector<32x128xf32>
      %55 = arith.mulf %17, %54 : vector<32x128xf32>
      %56 = arith.truncf %55 : vector<32x128xf32> to vector<32x128xbf16>
      %c0_29 = arith.constant 0 : index
      %c0_30 = arith.constant 0 : index
      %57 = vector.load %arg6[%c0_29, %c0_30] : memref<32x128xbf16, #tpu.memory_space<vmem>>, vector<32x128xbf16>
      tpu.vector_store %arg6[%c0_29, %c0_30], %56 {strides = array<i32>} : memref<32x128xbf16, #tpu.memory_space<vmem>>, vector<32x128xbf16>,
    } else {
    }
    return
  }
  func.func @transform_0(%arg0: i32, %arg1: i32, %arg2: i32) -> (i32, i32) {
    %c0_i32 = arith.constant 0 : i32
    return %arg0, %arg2 : i32, i32
  }
  func.func @transform_1(%arg0: i32, %arg1: i32, %arg2: i32) -> (i32, i32) {
    %c0_i32 = arith.constant 0 : i32
    return %arg2, %arg1 : i32, i32
  }
  func.func @transform_2(%arg0: i32, %arg1: i32, %arg2: i32) -> (i32, i32) {
    %c0_i32 = arith.constant 0 : i32
    %c0_i32_0 = arith.constant 0 : i32
    return %c0_i32, %arg1 : i32, i32
  }
  func.func @transform_3(%arg0: i32, %arg1: i32, %arg2: i32) -> (i32, i32) {
    %c0_i32 = arith.constant 0 : i32
    return %arg0, %arg1 : i32, i32
  }
}

module attributes {stable_mosaic.version = 11 : i64} {
  func.func @_fused_proj_head_kernel(%arg0: i32, %arg1: i32, %arg2: i32, %arg3: memref<1x16x128xbf16, #tpu.memory_space<vmem>>, %arg4: memref<128x128xbf16, #tpu.memory_space<vmem>>, %arg5: memref<1x128xf32, #tpu.memory_space<vmem>>, %arg6: memref<128x8xbf16, #tpu.memory_space<vmem>>, %arg7: memref<1x8xf32, #tpu.memory_space<vmem>>, %arg8: memref<1x8x16xbf16, #tpu.memory_space<vmem>>, %arg9: memref<1x1x128xf32, #tpu.memory_space<vmem>>, %arg10: memref<16x8xf32, #tpu.memory_space<vmem>>) attributes {dimension_semantics = [#tpu.dimension_semantics<parallel>, #tpu.dimension_semantics<parallel>, #tpu.dimension_semantics<arbitrary>], iteration_bounds = array<i64: 2, 1, 1>, scalar_prefetch = 0 : i64, scratch_operands = 1 : i64, tpu.core_type = #tpu.core_type<tc>, window_params = [{transform_indices = @transform_0, window_bounds = array<i64: 1, 16, 128>}, {transform_indices = @transform_1, window_bounds = array<i64: 128, 128>}, {transform_indices = @transform_2, window_bounds = array<i64: 1, 128>}, {transform_indices = @transform_3, window_bounds = array<i64: 128, 8>}, {pipeline_mode = #tpu.pipeline_mode<synchronous>, transform_indices = @transform_4, window_bounds = array<i64: 1, 8>}, {transform_indices = @transform_5, window_bounds = array<i64: 1, 8, 16>}, {transform_indices = @transform_6, window_bounds = array<i64: 1, 1, 128>}]} {
    %c0 = arith.constant 0 : index
    %c0_0 = arith.constant 0 : index
    %c0_1 = arith.constant 0 : index
    %0 = vector.load %arg3[%c0, %c0_0, %c0_1] : memref<1x16x128xbf16, #tpu.memory_space<vmem>>, vector<1x16x128xbf16>
    %1 = vector.shape_cast %0 : vector<1x16x128xbf16> to vector<16x128xbf16>
    %c0_2 = arith.constant 0 : index
    %c0_3 = arith.constant 0 : index
    %2 = vector.load %arg4[%c0_2, %c0_3] : memref<128x128xbf16, #tpu.memory_space<vmem>>, vector<128x128xbf16>
    %cst = arith.constant dense<0.000000e+00> : vector<16x128xf32>
    %3 = tpu.matmul %1, %2, %cst {dimension_numbers = #tpu.dot_dimension_numbers<[1], [0], [0], [1], [0, 0, 1, 1], [], []>} : vector<16x128xbf16>, vector<128x128xbf16>, vector<16x128xf32> -> vector<16x128xf32>
    %c0_4 = arith.constant 0 : index
    %c0_5 = arith.constant 0 : index
    %4 = vector.load %arg5[%c0_4, %c0_5] : memref<1x128xf32, #tpu.memory_space<vmem>>, vector<1x128xf32>
    %5 = vector.broadcast %4 : vector<1x128xf32> to vector<16x128xf32>
    %6 = arith.addf %3, %5 : vector<16x128xf32>
    %cst_6 = arith.constant 5.000000e-01 : f32
    %7 = vector.broadcast %cst_6 : f32 to vector<16x128xf32>
    %8 = arith.mulf %7, %6 : vector<16x128xf32>
    %cst_7 = arith.constant 0.707106769 : f32
    %9 = vector.broadcast %cst_7 : f32 to vector<16x128xf32>
    %10 = arith.mulf %6, %9 : vector<16x128xf32>
    %cst_8 = arith.constant 0.000000e+00 : f32
    %11 = vector.broadcast %cst_8 : f32 to vector<16x128xf32>
    %12 = arith.cmpf oge, %10, %11 : vector<16x128xf32>
    %cst_9 = arith.constant 1.000000e+00 : f32
    %cst_10 = arith.constant -1.000000e+00 : f32
    %13 = vector.broadcast %cst_9 : f32 to vector<16x128xf32>
    %14 = vector.broadcast %cst_10 : f32 to vector<16x128xf32>
    %15 = arith.select %12, %13, %14 : vector<16x128xi1>, vector<16x128xf32>
    %16 = math.absf %10 : vector<16x128xf32>
    %cst_11 = arith.constant 0.327591091 : f32
    %17 = vector.broadcast %cst_11 : f32 to vector<16x128xf32>
    %18 = arith.mulf %17, %16 : vector<16x128xf32>
    %cst_12 = arith.constant 1.000000e+00 : f32
    %19 = vector.broadcast %cst_12 : f32 to vector<16x128xf32>
    %20 = arith.addf %19, %18 : vector<16x128xf32>
    %21 = tpu.reciprocal %20 {approx = true} : vector<16x128xf32> -> vector<16x128xf32>
    %cst_13 = arith.constant 1.06140542 : f32
    %22 = vector.broadcast %cst_13 : f32 to vector<16x128xf32>
    %23 = arith.mulf %21, %22 : vector<16x128xf32>
    %cst_14 = arith.constant -1.45315206 : f32
    %24 = vector.broadcast %cst_14 : f32 to vector<16x128xf32>
    %25 = arith.addf %24, %23 : vector<16x128xf32>
    %26 = arith.mulf %21, %25 : vector<16x128xf32>
    %cst_15 = arith.constant 1.42141378 : f32
    %27 = vector.broadcast %cst_15 : f32 to vector<16x128xf32>
    %28 = arith.addf %27, %26 : vector<16x128xf32>
    %29 = arith.mulf %21, %28 : vector<16x128xf32>
    %cst_16 = arith.constant -0.284496725 : f32
    %30 = vector.broadcast %cst_16 : f32 to vector<16x128xf32>
    %31 = arith.addf %30, %29 : vector<16x128xf32>
    %32 = arith.mulf %21, %31 : vector<16x128xf32>
    %cst_17 = arith.constant 0.254829586 : f32
    %33 = vector.broadcast %cst_17 : f32 to vector<16x128xf32>
    %34 = arith.addf %33, %32 : vector<16x128xf32>
    %35 = arith.mulf %21, %34 : vector<16x128xf32>
    %cst_18 = arith.constant 0.000000e+00 : f32
    %36 = vector.broadcast %cst_18 : f32 to vector<16x128xf32>
    %37 = arith.subf %36, %16 : vector<16x128xf32>
    %38 = arith.mulf %37, %16 : vector<16x128xf32>
    %39 = math.exp %38 : vector<16x128xf32>
    %40 = arith.mulf %35, %39 : vector<16x128xf32>
    %cst_19 = arith.constant 1.000000e+00 : f32
    %41 = vector.broadcast %cst_19 : f32 to vector<16x128xf32>
    %42 = arith.subf %41, %40 : vector<16x128xf32>
    %43 = arith.mulf %15, %42 : vector<16x128xf32>
    %cst_20 = arith.constant 1.000000e+00 : f32
    %44 = vector.broadcast %cst_20 : f32 to vector<16x128xf32>
    %45 = arith.addf %44, %43 : vector<16x128xf32>
    %46 = arith.mulf %8, %45 : vector<16x128xf32>
    %c16_i32 = arith.constant 16 : i32
    %47 = arith.muli %arg1, %c16_i32 : i32
    %48 = tpu.iota {dimensions = array<i32: 0>} : vector<16x1xi32>
    %49 = vector.broadcast %47 : i32 to vector<16x1xi32>
    %50 = arith.addi %49, %48 : vector<16x1xi32>
    %c16_i32_21 = arith.constant 16 : i32
    %51 = vector.broadcast %c16_i32_21 : i32 to vector<16x1xi32>
    %52 = arith.cmpi slt, %50, %51 : vector<16x1xi32>
    %cst_22 = arith.constant 0.000000e+00 : f32
    %53 = vector.shape_cast %52 : vector<16x1xi1> to vector<16x1xi1>
    %54 = vector.broadcast %53 : vector<16x1xi1> to vector<16x128xi1>
    %55 = vector.broadcast %cst_22 : f32 to vector<16x128xf32>
    %56 = arith.select %54, %46, %55 : vector<16x128xi1>, vector<16x128xf32>
    %cst_23 = arith.constant dense<0.000000e+00> : vector<128xf32>
    %57 = vector.multi_reduction <add>, %56, %cst_23 [0] : vector<16x128xf32> to vector<128xf32>
    %58 = vector.shape_cast %57 : vector<128xf32> to vector<1x128xf32>
    %59 = vector.shape_cast %58 : vector<1x128xf32> to vector<1x1x128xf32>
    %c0_24 = arith.constant 0 : index
    %c0_25 = arith.constant 0 : index
    %c0_26 = arith.constant 0 : index
    %60 = vector.load %arg9[%c0_24, %c0_25, %c0_26] : memref<1x1x128xf32, #tpu.memory_space<vmem>>, vector<1x1x128xf32>
    tpu.vector_store %arg9[%c0_24, %c0_25, %c0_26], %59 {strides = array<i32>} : memref<1x1x128xf32, #tpu.memory_space<vmem>>, vector<1x1x128xf32>,
    %c0_i32 = arith.constant 0 : i32
    %61 = arith.cmpi eq, %arg2, %c0_i32 : i32
    %62 = arith.extui %61 : i1 to i32
    %c0_i32_27 = arith.constant 0 : i32
    %63 = arith.cmpi ne, %62, %c0_i32_27 : i32
    scf.if %63 {
      %cst_37 = arith.constant 0.000000e+00 : f32
      %73 = vector.broadcast %cst_37 : f32 to vector<16x8xf32>
      %c0_38 = arith.constant 0 : index
      %c0_39 = arith.constant 0 : index
      %74 = vector.load %arg10[%c0_38, %c0_39] : memref<16x8xf32, #tpu.memory_space<vmem>>, vector<16x8xf32>
      tpu.vector_store %arg10[%c0_38, %c0_39], %73 {strides = array<i32>} : memref<16x8xf32, #tpu.memory_space<vmem>>, vector<16x8xf32>,
    } else {
    }
    %c0_28 = arith.constant 0 : index
    %c0_29 = arith.constant 0 : index
    %64 = vector.load %arg10[%c0_28, %c0_29] : memref<16x8xf32, #tpu.memory_space<vmem>>, vector<16x8xf32>
    %65 = arith.truncf %56 : vector<16x128xf32> to vector<16x128xbf16>
    %c0_30 = arith.constant 0 : index
    %c0_31 = arith.constant 0 : index
    %66 = vector.load %arg6[%c0_30, %c0_31] : memref<128x8xbf16, #tpu.memory_space<vmem>>, vector<128x8xbf16>
    %cst_32 = arith.constant dense<0.000000e+00> : vector<16x8xf32>
    %67 = tpu.matmul %65, %66, %cst_32 {dimension_numbers = #tpu.dot_dimension_numbers<[1], [0], [0], [1], [0, 0, 1, 1], [], []>} : vector<16x128xbf16>, vector<128x8xbf16>, vector<16x8xf32> -> vector<16x8xf32>
    %68 = arith.addf %64, %67 : vector<16x8xf32>
    %c0_33 = arith.constant 0 : index
    %c0_34 = arith.constant 0 : index
    %69 = vector.load %arg10[%c0_33, %c0_34] : memref<16x8xf32, #tpu.memory_space<vmem>>, vector<16x8xf32>
    tpu.vector_store %arg10[%c0_33, %c0_34], %68 {strides = array<i32>} : memref<16x8xf32, #tpu.memory_space<vmem>>, vector<16x8xf32>,
    %c0_i32_35 = arith.constant 0 : i32
    %70 = arith.cmpi eq, %arg2, %c0_i32_35 : i32
    %71 = arith.extui %70 : i1 to i32
    %c0_i32_36 = arith.constant 0 : i32
    %72 = arith.cmpi ne, %71, %c0_i32_36 : i32
    scf.if %72 {
      %c0_37 = arith.constant 0 : index
      %c0_38 = arith.constant 0 : index
      %73 = vector.load %arg10[%c0_37, %c0_38] : memref<16x8xf32, #tpu.memory_space<vmem>>, vector<16x8xf32>
      %c0_39 = arith.constant 0 : index
      %c0_40 = arith.constant 0 : index
      %74 = vector.load %arg7[%c0_39, %c0_40] : memref<1x8xf32, #tpu.memory_space<vmem>>, vector<1x8xf32>
      %75 = vector.broadcast %74 : vector<1x8xf32> to vector<16x8xf32>
      %76 = arith.addf %73, %75 : vector<16x8xf32>
      %cst_41 = arith.constant 0.000000e+00 : f32
      %77 = vector.shape_cast %52 : vector<16x1xi1> to vector<16x1xi1>
      %78 = vector.broadcast %77 : vector<16x1xi1> to vector<16x8xi1>
      %79 = vector.broadcast %cst_41 : f32 to vector<16x8xf32>
      %80 = arith.select %78, %76, %79 : vector<16x8xi1>, vector<16x8xf32>
      %81 = tpu.transpose %80, [1, 0] : vector<16x8xf32> -> vector<8x16xf32>
      %82 = arith.truncf %81 : vector<8x16xf32> to vector<8x16xbf16>
      %c0_42 = arith.constant 0 : index
      %c0_43 = arith.constant 0 : index
      %c0_44 = arith.constant 0 : index
      %83 = vector.load %arg8[%c0_42, %c0_43, %c0_44] : memref<1x8x16xbf16, #tpu.memory_space<vmem>>, vector<1x8x16xbf16>
      %84 = vector.shape_cast %83 : vector<1x8x16xbf16> to vector<8x16xbf16>
      %85 = vector.shape_cast %82 : vector<8x16xbf16> to vector<1x8x16xbf16>
      tpu.vector_store %arg8[%c0_42, %c0_43, %c0_44], %85 {strides = array<i32>} : memref<1x8x16xbf16, #tpu.memory_space<vmem>>, vector<1x8x16xbf16>,
    } else {
    }
    return
  }
  func.func @transform_0(%arg0: i32, %arg1: i32, %arg2: i32) -> (i32, i32, i32) {
    %c0_i32 = arith.constant 0 : i32
    %c0_i32_0 = arith.constant 0 : i32
    return %arg0, %arg1, %c0_i32 : i32, i32, i32
  }
  func.func @transform_1(%arg0: i32, %arg1: i32, %arg2: i32) -> (i32, i32) {
    %c0_i32 = arith.constant 0 : i32
    %c0_i32_0 = arith.constant 0 : i32
    return %c0_i32, %arg2 : i32, i32
  }
  func.func @transform_2(%arg0: i32, %arg1: i32, %arg2: i32) -> (i32, i32) {
    %c0_i32 = arith.constant 0 : i32
    %c0_i32_0 = arith.constant 0 : i32
    return %c0_i32, %arg2 : i32, i32
  }
  func.func @transform_3(%arg0: i32, %arg1: i32, %arg2: i32) -> (i32, i32) {
    %c0_i32 = arith.constant 0 : i32
    %c0_i32_0 = arith.constant 0 : i32
    return %arg2, %c0_i32 : i32, i32
  }
  func.func @transform_4(%arg0: i32, %arg1: i32, %arg2: i32) -> (i32, i32) {
    %c0_i32 = arith.constant 0 : i32
    %c0_i32_0 = arith.constant 0 : i32
    %c0_i32_1 = arith.constant 0 : i32
    return %c0_i32, %c0_i32_0 : i32, i32
  }
  func.func @transform_5(%arg0: i32, %arg1: i32, %arg2: i32) -> (i32, i32, i32) {
    %c0_i32 = arith.constant 0 : i32
    %c0_i32_0 = arith.constant 0 : i32
    return %arg0, %c0_i32, %arg1 : i32, i32, i32
  }
  func.func @transform_6(%arg0: i32, %arg1: i32, %arg2: i32) -> (i32, i32, i32) {
    %c0_i32 = arith.constant 0 : i32
    return %arg0, %arg1, %arg2 : i32, i32, i32
  }
}

module attributes {stable_mosaic.version = 11 : i64} {
  func.func @_resize_kernel(%arg0: i32, %arg1: i32, %arg2: i32, %arg3: memref<16x4xbf16, #tpu.memory_space<vmem>>, %arg4: memref<1x8x4x4xbf16, #tpu.memory_space<vmem>>, %arg5: memref<4x16xbf16, #tpu.memory_space<vmem>>, %arg6: memref<1x8x16x16xf32, #tpu.memory_space<vmem>>, %arg7: memref<32x16xbf16, #tpu.memory_space<vmem>>) attributes {dimension_semantics = [#tpu.dimension_semantics<parallel>, #tpu.dimension_semantics<parallel>, #tpu.dimension_semantics<arbitrary>], iteration_bounds = array<i64: 2, 1, 1>, scalar_prefetch = 0 : i64, scratch_operands = 1 : i64, tpu.core_type = #tpu.core_type<tc>, window_params = [{transform_indices = @transform_0, window_bounds = array<i64: 16, 4>}, {transform_indices = @transform_1, window_bounds = array<i64: 1, 8, 4, 4>}, {pipeline_mode = #tpu.pipeline_mode<synchronous>, transform_indices = @transform_2, window_bounds = array<i64: 4, 16>}, {transform_indices = @transform_3, window_bounds = array<i64: 1, 8, 16, 16>}]} {
    %c0_i32 = arith.constant 0 : i32
    %0 = arith.cmpi eq, %arg2, %c0_i32 : i32
    %1 = arith.extui %0 : i1 to i32
    %c0_i32_0 = arith.constant 0 : i32
    %2 = arith.cmpi ne, %1, %c0_i32_0 : i32
    scf.if %2 {
      %c0_44 = arith.constant 0 : index
      %c0_45 = arith.constant 0 : index
      %44 = vector.load %arg5[%c0_44, %c0_45] : memref<4x16xbf16, #tpu.memory_space<vmem>>, vector<4x16xbf16>
      %c0_46 = arith.constant 0 : index
      %c0_47 = arith.constant 0 : index
      %c0_48 = arith.constant 0 : index
      %c0_49 = arith.constant 0 : index
      %45 = vector.load %arg4[%c0_46, %c0_47, %c0_48, %c0_49] : memref<1x8x4x4xbf16, #tpu.memory_space<vmem>>, vector<1x1x4x4xbf16>
      %46 = vector.shape_cast %45 : vector<1x1x4x4xbf16> to vector<4x4xbf16>
      %cst_50 = arith.constant dense<0.000000e+00> : vector<4x16xf32>
      %47 = tpu.matmul %46, %44, %cst_50 {dimension_numbers = #tpu.dot_dimension_numbers<[1], [0], [0], [1], [0, 0, 1, 1], [], []>} : vector<4x4xbf16>, vector<4x16xbf16>, vector<4x16xf32> -> vector<4x16xf32>
      %48 = arith.truncf %47 : vector<4x16xf32> to vector<4x16xbf16>
      %c0_51 = arith.constant 0 : index
      %c0_52 = arith.constant 0 : index
      %49 = vector.load %arg7[%c0_51, %c0_52] : memref<32x16xbf16, #tpu.memory_space<vmem>>, vector<4x16xbf16>
      tpu.vector_store %arg7[%c0_51, %c0_52], %48 {strides = array<i32>} : memref<32x16xbf16, #tpu.memory_space<vmem>>, vector<4x16xbf16>,
      %c0_53 = arith.constant 0 : index
      %c1_54 = arith.constant 1 : index
      %c0_55 = arith.constant 0 : index
      %c0_56 = arith.constant 0 : index
      %50 = vector.load %arg4[%c0_53, %c1_54, %c0_55, %c0_56] : memref<1x8x4x4xbf16, #tpu.memory_space<vmem>>, vector<1x1x4x4xbf16>
      %51 = vector.shape_cast %50 : vector<1x1x4x4xbf16> to vector<4x4xbf16>
      %cst_57 = arith.constant dense<0.000000e+00> : vector<4x16xf32>
      %52 = tpu.matmul %51, %44, %cst_57 {dimension_numbers = #tpu.dot_dimension_numbers<[1], [0], [0], [1], [0, 0, 1, 1], [], []>} : vector<4x4xbf16>, vector<4x16xbf16>, vector<4x16xf32> -> vector<4x16xf32>
      %53 = arith.truncf %52 : vector<4x16xf32> to vector<4x16xbf16>
      %c4_58 = arith.constant 4 : index
      %c0_59 = arith.constant 0 : index
      %54 = vector.load %arg7[%c4_58, %c0_59] : memref<32x16xbf16, #tpu.memory_space<vmem>>, vector<4x16xbf16>
      tpu.vector_store %arg7[%c4_58, %c0_59], %53 {strides = array<i32>} : memref<32x16xbf16, #tpu.memory_space<vmem>>, vector<4x16xbf16>,
      %c0_60 = arith.constant 0 : index
      %c2_61 = arith.constant 2 : index
      %c0_62 = arith.constant 0 : index
      %c0_63 = arith.constant 0 : index
      %55 = vector.load %arg4[%c0_60, %c2_61, %c0_62, %c0_63] : memref<1x8x4x4xbf16, #tpu.memory_space<vmem>>, vector<1x1x4x4xbf16>
      %56 = vector.shape_cast %55 : vector<1x1x4x4xbf16> to vector<4x4xbf16>
      %cst_64 = arith.constant dense<0.000000e+00> : vector<4x16xf32>
      %57 = tpu.matmul %56, %44, %cst_64 {dimension_numbers = #tpu.dot_dimension_numbers<[1], [0], [0], [1], [0, 0, 1, 1], [], []>} : vector<4x4xbf16>, vector<4x16xbf16>, vector<4x16xf32> -> vector<4x16xf32>
      %58 = arith.truncf %57 : vector<4x16xf32> to vector<4x16xbf16>
      %c8_65 = arith.constant 8 : index
      %c0_66 = arith.constant 0 : index
      %59 = vector.load %arg7[%c8_65, %c0_66] : memref<32x16xbf16, #tpu.memory_space<vmem>>, vector<4x16xbf16>
      tpu.vector_store %arg7[%c8_65, %c0_66], %58 {strides = array<i32>} : memref<32x16xbf16, #tpu.memory_space<vmem>>, vector<4x16xbf16>,
      %c0_67 = arith.constant 0 : index
      %c3_68 = arith.constant 3 : index
      %c0_69 = arith.constant 0 : index
      %c0_70 = arith.constant 0 : index
      %60 = vector.load %arg4[%c0_67, %c3_68, %c0_69, %c0_70] : memref<1x8x4x4xbf16, #tpu.memory_space<vmem>>, vector<1x1x4x4xbf16>
      %61 = vector.shape_cast %60 : vector<1x1x4x4xbf16> to vector<4x4xbf16>
      %cst_71 = arith.constant dense<0.000000e+00> : vector<4x16xf32>
      %62 = tpu.matmul %61, %44, %cst_71 {dimension_numbers = #tpu.dot_dimension_numbers<[1], [0], [0], [1], [0, 0, 1, 1], [], []>} : vector<4x4xbf16>, vector<4x16xbf16>, vector<4x16xf32> -> vector<4x16xf32>
      %63 = arith.truncf %62 : vector<4x16xf32> to vector<4x16xbf16>
      %c12_72 = arith.constant 12 : index
      %c0_73 = arith.constant 0 : index
      %64 = vector.load %arg7[%c12_72, %c0_73] : memref<32x16xbf16, #tpu.memory_space<vmem>>, vector<4x16xbf16>
      tpu.vector_store %arg7[%c12_72, %c0_73], %63 {strides = array<i32>} : memref<32x16xbf16, #tpu.memory_space<vmem>>, vector<4x16xbf16>,
      %c0_74 = arith.constant 0 : index
      %c4_75 = arith.constant 4 : index
      %c0_76 = arith.constant 0 : index
      %c0_77 = arith.constant 0 : index
      %65 = vector.load %arg4[%c0_74, %c4_75, %c0_76, %c0_77] : memref<1x8x4x4xbf16, #tpu.memory_space<vmem>>, vector<1x1x4x4xbf16>
      %66 = vector.shape_cast %65 : vector<1x1x4x4xbf16> to vector<4x4xbf16>
      %cst_78 = arith.constant dense<0.000000e+00> : vector<4x16xf32>
      %67 = tpu.matmul %66, %44, %cst_78 {dimension_numbers = #tpu.dot_dimension_numbers<[1], [0], [0], [1], [0, 0, 1, 1], [], []>} : vector<4x4xbf16>, vector<4x16xbf16>, vector<4x16xf32> -> vector<4x16xf32>
      %68 = arith.truncf %67 : vector<4x16xf32> to vector<4x16xbf16>
      %c16_79 = arith.constant 16 : index
      %c0_80 = arith.constant 0 : index
      %69 = vector.load %arg7[%c16_79, %c0_80] : memref<32x16xbf16, #tpu.memory_space<vmem>>, vector<4x16xbf16>
      tpu.vector_store %arg7[%c16_79, %c0_80], %68 {strides = array<i32>} : memref<32x16xbf16, #tpu.memory_space<vmem>>, vector<4x16xbf16>,
      %c0_81 = arith.constant 0 : index
      %c5_82 = arith.constant 5 : index
      %c0_83 = arith.constant 0 : index
      %c0_84 = arith.constant 0 : index
      %70 = vector.load %arg4[%c0_81, %c5_82, %c0_83, %c0_84] : memref<1x8x4x4xbf16, #tpu.memory_space<vmem>>, vector<1x1x4x4xbf16>
      %71 = vector.shape_cast %70 : vector<1x1x4x4xbf16> to vector<4x4xbf16>
      %cst_85 = arith.constant dense<0.000000e+00> : vector<4x16xf32>
      %72 = tpu.matmul %71, %44, %cst_85 {dimension_numbers = #tpu.dot_dimension_numbers<[1], [0], [0], [1], [0, 0, 1, 1], [], []>} : vector<4x4xbf16>, vector<4x16xbf16>, vector<4x16xf32> -> vector<4x16xf32>
      %73 = arith.truncf %72 : vector<4x16xf32> to vector<4x16xbf16>
      %c20_86 = arith.constant 20 : index
      %c0_87 = arith.constant 0 : index
      %74 = vector.load %arg7[%c20_86, %c0_87] : memref<32x16xbf16, #tpu.memory_space<vmem>>, vector<4x16xbf16>
      tpu.vector_store %arg7[%c20_86, %c0_87], %73 {strides = array<i32>} : memref<32x16xbf16, #tpu.memory_space<vmem>>, vector<4x16xbf16>,
      %c0_88 = arith.constant 0 : index
      %c6_89 = arith.constant 6 : index
      %c0_90 = arith.constant 0 : index
      %c0_91 = arith.constant 0 : index
      %75 = vector.load %arg4[%c0_88, %c6_89, %c0_90, %c0_91] : memref<1x8x4x4xbf16, #tpu.memory_space<vmem>>, vector<1x1x4x4xbf16>
      %76 = vector.shape_cast %75 : vector<1x1x4x4xbf16> to vector<4x4xbf16>
      %cst_92 = arith.constant dense<0.000000e+00> : vector<4x16xf32>
      %77 = tpu.matmul %76, %44, %cst_92 {dimension_numbers = #tpu.dot_dimension_numbers<[1], [0], [0], [1], [0, 0, 1, 1], [], []>} : vector<4x4xbf16>, vector<4x16xbf16>, vector<4x16xf32> -> vector<4x16xf32>
      %78 = arith.truncf %77 : vector<4x16xf32> to vector<4x16xbf16>
      %c24_93 = arith.constant 24 : index
      %c0_94 = arith.constant 0 : index
      %79 = vector.load %arg7[%c24_93, %c0_94] : memref<32x16xbf16, #tpu.memory_space<vmem>>, vector<4x16xbf16>
      tpu.vector_store %arg7[%c24_93, %c0_94], %78 {strides = array<i32>} : memref<32x16xbf16, #tpu.memory_space<vmem>>, vector<4x16xbf16>,
      %c0_95 = arith.constant 0 : index
      %c7_96 = arith.constant 7 : index
      %c0_97 = arith.constant 0 : index
      %c0_98 = arith.constant 0 : index
      %80 = vector.load %arg4[%c0_95, %c7_96, %c0_97, %c0_98] : memref<1x8x4x4xbf16, #tpu.memory_space<vmem>>, vector<1x1x4x4xbf16>
      %81 = vector.shape_cast %80 : vector<1x1x4x4xbf16> to vector<4x4xbf16>
      %cst_99 = arith.constant dense<0.000000e+00> : vector<4x16xf32>
      %82 = tpu.matmul %81, %44, %cst_99 {dimension_numbers = #tpu.dot_dimension_numbers<[1], [0], [0], [1], [0, 0, 1, 1], [], []>} : vector<4x4xbf16>, vector<4x16xbf16>, vector<4x16xf32> -> vector<4x16xf32>
      %83 = arith.truncf %82 : vector<4x16xf32> to vector<4x16xbf16>
      %c28_100 = arith.constant 28 : index
      %c0_101 = arith.constant 0 : index
      %84 = vector.load %arg7[%c28_100, %c0_101] : memref<32x16xbf16, #tpu.memory_space<vmem>>, vector<4x16xbf16>
      tpu.vector_store %arg7[%c28_100, %c0_101], %83 {strides = array<i32>} : memref<32x16xbf16, #tpu.memory_space<vmem>>, vector<4x16xbf16>,
    } else {
    }
    %c0 = arith.constant 0 : index
    %c0_1 = arith.constant 0 : index
    %3 = vector.load %arg3[%c0, %c0_1] : memref<16x4xbf16, #tpu.memory_space<vmem>>, vector<16x4xbf16>
    %c0_2 = arith.constant 0 : index
    %c0_3 = arith.constant 0 : index
    %4 = vector.load %arg7[%c0_2, %c0_3] : memref<32x16xbf16, #tpu.memory_space<vmem>>, vector<4x16xbf16>
    %cst = arith.constant dense<0.000000e+00> : vector<16x16xf32>
    %5 = tpu.matmul %3, %4, %cst {dimension_numbers = #tpu.dot_dimension_numbers<[1], [0], [0], [1], [0, 0, 1, 1], [], []>} : vector<16x4xbf16>, vector<4x16xbf16>, vector<16x16xf32> -> vector<16x16xf32>
    %c0_4 = arith.constant 0 : index
    %c0_5 = arith.constant 0 : index
    %c0_6 = arith.constant 0 : index
    %c0_7 = arith.constant 0 : index
    %6 = vector.load %arg6[%c0_4, %c0_5, %c0_6, %c0_7] : memref<1x8x16x16xf32, #tpu.memory_space<vmem>>, vector<1x1x16x16xf32>
    %7 = vector.shape_cast %6 : vector<1x1x16x16xf32> to vector<16x16xf32>
    %8 = vector.shape_cast %5 : vector<16x16xf32> to vector<1x1x16x16xf32>
    tpu.vector_store %arg6[%c0_4, %c0_5, %c0_6, %c0_7], %8 {strides = array<i32>} : memref<1x8x16x16xf32, #tpu.memory_space<vmem>>, vector<1x1x16x16xf32>,
    %c4 = arith.constant 4 : index
    %c0_8 = arith.constant 0 : index
    %9 = vector.load %arg7[%c4, %c0_8] : memref<32x16xbf16, #tpu.memory_space<vmem>>, vector<4x16xbf16>
    %cst_9 = arith.constant dense<0.000000e+00> : vector<16x16xf32>
    %10 = tpu.matmul %3, %9, %cst_9 {dimension_numbers = #tpu.dot_dimension_numbers<[1], [0], [0], [1], [0, 0, 1, 1], [], []>} : vector<16x4xbf16>, vector<4x16xbf16>, vector<16x16xf32> -> vector<16x16xf32>
    %c0_10 = arith.constant 0 : index
    %c1 = arith.constant 1 : index
    %c0_11 = arith.constant 0 : index
    %c0_12 = arith.constant 0 : index
    %11 = vector.load %arg6[%c0_10, %c1, %c0_11, %c0_12] : memref<1x8x16x16xf32, #tpu.memory_space<vmem>>, vector<1x1x16x16xf32>
    %12 = vector.shape_cast %11 : vector<1x1x16x16xf32> to vector<16x16xf32>
    %13 = vector.shape_cast %10 : vector<16x16xf32> to vector<1x1x16x16xf32>
    tpu.vector_store %arg6[%c0_10, %c1, %c0_11, %c0_12], %13 {strides = array<i32>} : memref<1x8x16x16xf32, #tpu.memory_space<vmem>>, vector<1x1x16x16xf32>,
    %c8 = arith.constant 8 : index
    %c0_13 = arith.constant 0 : index
    %14 = vector.load %arg7[%c8, %c0_13] : memref<32x16xbf16, #tpu.memory_space<vmem>>, vector<4x16xbf16>
    %cst_14 = arith.constant dense<0.000000e+00> : vector<16x16xf32>
    %15 = tpu.matmul %3, %14, %cst_14 {dimension_numbers = #tpu.dot_dimension_numbers<[1], [0], [0], [1], [0, 0, 1, 1], [], []>} : vector<16x4xbf16>, vector<4x16xbf16>, vector<16x16xf32> -> vector<16x16xf32>
    %c0_15 = arith.constant 0 : index
    %c2 = arith.constant 2 : index
    %c0_16 = arith.constant 0 : index
    %c0_17 = arith.constant 0 : index
    %16 = vector.load %arg6[%c0_15, %c2, %c0_16, %c0_17] : memref<1x8x16x16xf32, #tpu.memory_space<vmem>>, vector<1x1x16x16xf32>
    %17 = vector.shape_cast %16 : vector<1x1x16x16xf32> to vector<16x16xf32>
    %18 = vector.shape_cast %15 : vector<16x16xf32> to vector<1x1x16x16xf32>
    tpu.vector_store %arg6[%c0_15, %c2, %c0_16, %c0_17], %18 {strides = array<i32>} : memref<1x8x16x16xf32, #tpu.memory_space<vmem>>, vector<1x1x16x16xf32>,
    %c12 = arith.constant 12 : index
    %c0_18 = arith.constant 0 : index
    %19 = vector.load %arg7[%c12, %c0_18] : memref<32x16xbf16, #tpu.memory_space<vmem>>, vector<4x16xbf16>
    %cst_19 = arith.constant dense<0.000000e+00> : vector<16x16xf32>
    %20 = tpu.matmul %3, %19, %cst_19 {dimension_numbers = #tpu.dot_dimension_numbers<[1], [0], [0], [1], [0, 0, 1, 1], [], []>} : vector<16x4xbf16>, vector<4x16xbf16>, vector<16x16xf32> -> vector<16x16xf32>
    %c0_20 = arith.constant 0 : index
    %c3 = arith.constant 3 : index
    %c0_21 = arith.constant 0 : index
    %c0_22 = arith.constant 0 : index
    %21 = vector.load %arg6[%c0_20, %c3, %c0_21, %c0_22] : memref<1x8x16x16xf32, #tpu.memory_space<vmem>>, vector<1x1x16x16xf32>
    %22 = vector.shape_cast %21 : vector<1x1x16x16xf32> to vector<16x16xf32>
    %23 = vector.shape_cast %20 : vector<16x16xf32> to vector<1x1x16x16xf32>
    tpu.vector_store %arg6[%c0_20, %c3, %c0_21, %c0_22], %23 {strides = array<i32>} : memref<1x8x16x16xf32, #tpu.memory_space<vmem>>, vector<1x1x16x16xf32>,
    %c16 = arith.constant 16 : index
    %c0_23 = arith.constant 0 : index
    %24 = vector.load %arg7[%c16, %c0_23] : memref<32x16xbf16, #tpu.memory_space<vmem>>, vector<4x16xbf16>
    %cst_24 = arith.constant dense<0.000000e+00> : vector<16x16xf32>
    %25 = tpu.matmul %3, %24, %cst_24 {dimension_numbers = #tpu.dot_dimension_numbers<[1], [0], [0], [1], [0, 0, 1, 1], [], []>} : vector<16x4xbf16>, vector<4x16xbf16>, vector<16x16xf32> -> vector<16x16xf32>
    %c0_25 = arith.constant 0 : index
    %c4_26 = arith.constant 4 : index
    %c0_27 = arith.constant 0 : index
    %c0_28 = arith.constant 0 : index
    %26 = vector.load %arg6[%c0_25, %c4_26, %c0_27, %c0_28] : memref<1x8x16x16xf32, #tpu.memory_space<vmem>>, vector<1x1x16x16xf32>
    %27 = vector.shape_cast %26 : vector<1x1x16x16xf32> to vector<16x16xf32>
    %28 = vector.shape_cast %25 : vector<16x16xf32> to vector<1x1x16x16xf32>
    tpu.vector_store %arg6[%c0_25, %c4_26, %c0_27, %c0_28], %28 {strides = array<i32>} : memref<1x8x16x16xf32, #tpu.memory_space<vmem>>, vector<1x1x16x16xf32>,
    %c20 = arith.constant 20 : index
    %c0_29 = arith.constant 0 : index
    %29 = vector.load %arg7[%c20, %c0_29] : memref<32x16xbf16, #tpu.memory_space<vmem>>, vector<4x16xbf16>
    %cst_30 = arith.constant dense<0.000000e+00> : vector<16x16xf32>
    %30 = tpu.matmul %3, %29, %cst_30 {dimension_numbers = #tpu.dot_dimension_numbers<[1], [0], [0], [1], [0, 0, 1, 1], [], []>} : vector<16x4xbf16>, vector<4x16xbf16>, vector<16x16xf32> -> vector<16x16xf32>
    %c0_31 = arith.constant 0 : index
    %c5 = arith.constant 5 : index
    %c0_32 = arith.constant 0 : index
    %c0_33 = arith.constant 0 : index
    %31 = vector.load %arg6[%c0_31, %c5, %c0_32, %c0_33] : memref<1x8x16x16xf32, #tpu.memory_space<vmem>>, vector<1x1x16x16xf32>
    %32 = vector.shape_cast %31 : vector<1x1x16x16xf32> to vector<16x16xf32>
    %33 = vector.shape_cast %30 : vector<16x16xf32> to vector<1x1x16x16xf32>
    tpu.vector_store %arg6[%c0_31, %c5, %c0_32, %c0_33], %33 {strides = array<i32>} : memref<1x8x16x16xf32, #tpu.memory_space<vmem>>, vector<1x1x16x16xf32>,
    %c24 = arith.constant 24 : index
    %c0_34 = arith.constant 0 : index
    %34 = vector.load %arg7[%c24, %c0_34] : memref<32x16xbf16, #tpu.memory_space<vmem>>, vector<4x16xbf16>
    %cst_35 = arith.constant dense<0.000000e+00> : vector<16x16xf32>
    %35 = tpu.matmul %3, %34, %cst_35 {dimension_numbers = #tpu.dot_dimension_numbers<[1], [0], [0], [1], [0, 0, 1, 1], [], []>} : vector<16x4xbf16>, vector<4x16xbf16>, vector<16x16xf32> -> vector<16x16xf32>
    %c0_36 = arith.constant 0 : index
    %c6 = arith.constant 6 : index
    %c0_37 = arith.constant 0 : index
    %c0_38 = arith.constant 0 : index
    %36 = vector.load %arg6[%c0_36, %c6, %c0_37, %c0_38] : memref<1x8x16x16xf32, #tpu.memory_space<vmem>>, vector<1x1x16x16xf32>
    %37 = vector.shape_cast %36 : vector<1x1x16x16xf32> to vector<16x16xf32>
    %38 = vector.shape_cast %35 : vector<16x16xf32> to vector<1x1x16x16xf32>
    tpu.vector_store %arg6[%c0_36, %c6, %c0_37, %c0_38], %38 {strides = array<i32>} : memref<1x8x16x16xf32, #tpu.memory_space<vmem>>, vector<1x1x16x16xf32>,
    %c28 = arith.constant 28 : index
    %c0_39 = arith.constant 0 : index
    %39 = vector.load %arg7[%c28, %c0_39] : memref<32x16xbf16, #tpu.memory_space<vmem>>, vector<4x16xbf16>
    %cst_40 = arith.constant dense<0.000000e+00> : vector<16x16xf32>
    %40 = tpu.matmul %3, %39, %cst_40 {dimension_numbers = #tpu.dot_dimension_numbers<[1], [0], [0], [1], [0, 0, 1, 1], [], []>} : vector<16x4xbf16>, vector<4x16xbf16>, vector<16x16xf32> -> vector<16x16xf32>
    %c0_41 = arith.constant 0 : index
    %c7 = arith.constant 7 : index
    %c0_42 = arith.constant 0 : index
    %c0_43 = arith.constant 0 : index
    %41 = vector.load %arg6[%c0_41, %c7, %c0_42, %c0_43] : memref<1x8x16x16xf32, #tpu.memory_space<vmem>>, vector<1x1x16x16xf32>
    %42 = vector.shape_cast %41 : vector<1x1x16x16xf32> to vector<16x16xf32>
    %43 = vector.shape_cast %40 : vector<16x16xf32> to vector<1x1x16x16xf32>
    tpu.vector_store %arg6[%c0_41, %c7, %c0_42, %c0_43], %43 {strides = array<i32>} : memref<1x8x16x16xf32, #tpu.memory_space<vmem>>, vector<1x1x16x16xf32>,
    return
  }
  func.func @transform_0(%arg0: i32, %arg1: i32, %arg2: i32) -> (i32, i32) {
    %c0_i32 = arith.constant 0 : i32
    %c0_i32_0 = arith.constant 0 : i32
    return %arg2, %c0_i32 : i32, i32
  }
  func.func @transform_1(%arg0: i32, %arg1: i32, %arg2: i32) -> (i32, i32, i32, i32) {
    %c0_i32 = arith.constant 0 : i32
    %c0_i32_0 = arith.constant 0 : i32
    %c0_i32_1 = arith.constant 0 : i32
    return %arg0, %arg1, %c0_i32, %c0_i32_0 : i32, i32, i32, i32
  }
  func.func @transform_2(%arg0: i32, %arg1: i32, %arg2: i32) -> (i32, i32) {
    %c0_i32 = arith.constant 0 : i32
    %c0_i32_0 = arith.constant 0 : i32
    %c0_i32_1 = arith.constant 0 : i32
    return %c0_i32, %c0_i32_0 : i32, i32
  }
  func.func @transform_3(%arg0: i32, %arg1: i32, %arg2: i32) -> (i32, i32, i32, i32) {
    %c0_i32 = arith.constant 0 : i32
    %c0_i32_0 = arith.constant 0 : i32
    return %arg0, %arg1, %arg2, %c0_i32 : i32, i32, i32, i32
  }
}

</mosaic_0001>

<bundles_post_ra>
// kernel: _forward.3
= control target key start
LH: loop header
LB: loop body
LE: loop exit
PB: predicated region body
PF: predicated region fallthrough
CT: control target
= control target key end

     0   :  { %s489_s1 = inlined_call_operand.vmem [shape: bf16[128,128], index: 1, kind: input, shape index: {}]   ;;  %s490_s0 = inlined_call_operand.vmem [shape: bf16[32,128], index: 0, kind: input, shape index: {}]   ;;  %s491_s2 = inlined_call_operand.vmem [shape: f32[1,128], index: 2, kind: input, shape index: {}]   ;;  %s492_s3 = inlined_call_operand.vmem [shape: bf16[32,128], index: 3, kind: output, shape index: {}]  }
   0x1   :  { %v371_v0 = vld [vmem:[%s489_s1] sm:$0xff]   ;;  %v372_v1 = vld [vmem:[%s489_s1 + $0x8] sm:$0xff]   ;;  %v373_v2 = vld [vmem:[%s489_s1 + $0x10] sm:$0xff]  }
   0x2   :  { %350 = vmatprep.subr.bf16.mxu0 %v371_v0  ;;  %v374_v3 = vld [vmem:[%s489_s1 + $0x18] sm:$0xff]   ;;  %v379_v4 = vld [vmem:[%s490_s0] sm:$0xff]   ;;  %v376_v6 = vld [vmem:[%s489_s1 + $0x28] sm:$0xff]  }
   0x3   :  { %351 = vmatpush3.bf16.msra.mxu0 %v371_v0  ;;  %366 = vmatprep.mubr.bf16.mxu0 %v379_v4  ;;  %v375_v5 = vld [vmem:[%s489_s1 + $0x20] sm:$0xff]   ;;  %v377_v7 = vld [vmem:[%s489_s1 + $0x30] sm:$0xff]   ;;  %v378_v8 = vld [vmem:[%s489_s1 + $0x38] sm:$0xff]  }
   0x4   :  { %352 = vmatprep.subr.bf16.mxu0 %v372_v1  ;;  %v380_v9 = vld [vmem:[%s490_s0 + $0x8] sm:$0xff]   ;;  %v320_v10 = vld [vmem:[%s491_s2] ss:$0 sm:$0xff] }
   0x7   :  { %353 = vmatpush3.bf16.msra.mxu0 %v372_v1 }
   0x8   :  { %354 = vmatprep.subr.bf16.mxu0 %v373_v2 }
   0xb   :  { %355 = vmatpush3.bf16.msra.mxu0 %v373_v2 }
   0xc   :  { %356 = vmatprep.subr.bf16.mxu0 %v374_v3 }
   0xf   :  { %357 = vmatpush3.bf16.msra.mxu0 %v374_v3 }
  0x10   :  { %358 = vmatprep.subr.bf16.mxu0 %v375_v5 }
  0x13   :  { %359 = vmatpush3.bf16.msra.mxu0 %v375_v5 }
  0x14   :  { %360 = vmatprep.subr.bf16.mxu0 %v376_v6 }
  0x17   :  { %361 = vmatpush3.bf16.msra.mxu0 %v376_v6 }
  0x18   :  { %362 = vmatprep.subr.bf16.mxu0 %v377_v7 }
  0x1b   :  { %363 = vmatpush3.bf16.msra.mxu0 %v377_v7 }
  0x1c   :  { %364 = vmatprep.subr.bf16.mxu0 %v378_v8 }
  0x1f   :  { %365 = vmatpush3.bf16.msra.mxu0 %v378_v8 }
  0x22   :  { %367 = vmatmul.mubr.bf16.vlgmr.msra.gmra.mrb[0].mxu0 %v380_v9 }
  0xf5   :  { %v368_v11 = vpop.f32.mrb[0].mxu0 }
  0xf6   :  { %v451_v12 = vadd.f32 %v368_v11, %v320_v10  ;;  %v141_v13 = vpop.f32.mrb[1].mxu0 }
  0xf7   :  { %v453_v14 = vadd.f32 %v320_v10, %v141_v13  ;;  %v369_v15 = vpop.f32.mrb[2].mxu0 }
  0xf8   :  { %v456_v16 = vmul.f32 0.70710677, %v451_v12  ;;  %v458_v17 = vadd.f32 %v369_v15, %v320_v10  ;;  %v144_v18 = vpop.f32.mrb[3].mxu0 }
  0xf9   :  { %v461_v19 = vmul.f32 0.70710677, %v453_v14  ;;  %v467_v22 = vadd.f32 %v320_v10, %v144_v18 }
  0xfa   :  { %v200_v20 = vand.u32 2147483647, %v456_v16  ;;  %v465_v21 = vmul.f32 0.70710677, %v458_v17  ;;  %vm192_vm0 = vcmp.ge.f32.partialorder %v456_v16, 0.0 }
  0xfb   :  { %v198_v23 = vand.u32 2147483647, %v461_v19  ;;  %v472_v28 = vmul.f32 0.70710677, %v467_v22  ;;  %vm190_vm1 = vcmp.ge.f32.partialorder %v461_v19, 0.0 }
  0xfc   :  { %v204_v24 = vmul.f32 0.3275911, %v200_v20  ;;  %v201_v26 = vand.u32 2147483647, %v465_v21  ;;  %v252_v35 = vsub.f32 0.0, %v200_v20  ;;  %vm193_vm2 = vcmp.ge.f32.partialorder %v465_v21, 0.0 }
  0xfd   :  { %v202_v25 = vmul.f32 0.3275911, %v198_v23  ;;  %v199_v31 = vand.u32 2147483647, %v472_v28  ;;  %v250_v36 = vsub.f32 0.0, %v198_v23  ;;  %vm191_vm3 = vcmp.ge.f32.partialorder %v472_v28, 0.0 }
  0xfe   :  { %v208_v27 = vadd.f32 1.0, %v204_v24  ;;  %v205_v30 = vmul.f32 0.3275911, %v201_v26  ;;  %v256_v38 = vmul.f32 %v252_v35, %v200_v20  ;;  %v253_v39 = vsub.f32 0.0, %v201_v26 }
  0xff   :  { %v206_v29 = vadd.f32 1.0, %v202_v25  ;;  %v203_v33 = vmul.f32 0.3275911, %v199_v31  ;;  %v254_v42 = vmul.f32 %v250_v36, %v198_v23  ;;  %v251_v44 = vsub.f32 0.0, %v199_v31 }
 0x100   :  { %381 = vrcp.f32 %v208_v27  ;;  %v209_v32 = vadd.f32 1.0, %v205_v30  ;;  %v262_v47 = vmul.f32 1.442695, %v256_v38  ;;  %v257_v49 = vmul.f32 %v253_v39, %v201_v26 }
 0x101   :  { %383 = vrcp.f32 %v206_v29  ;;  %v207_v34 = vadd.f32 1.0, %v203_v33  ;;  %v258_v51 = vmul.f32 1.442695, %v254_v42  ;;  %v255_v55 = vmul.f32 %v251_v44, %v199_v31 }
 0x102   :  { %385 = vrcp.f32 %v209_v32  ;;  %v264_v60 = vmul.f32 1.442695, %v257_v49  ;;  %v397_v36 = vmov -1.0   ;;  %v184_v49 = vmul.f32 0.5, %v451_v12 }
 0x103   :  { %387 = vrcp.f32 %v207_v34  ;;  %v260_v1 = vmul.f32 1.442695, %v255_v55  ;;  %v196_v38 = vsel %vm192_vm0, 1.0, %v397_v36  ;;  %v194_v16 = vsel %vm190_vm1, 1.0, %v397_v36 }
 0x104   :  { %389 = vpow2.f32 %v262_v47  ;;  %v197_v47 = vsel %vm193_vm2, 1.0, %v397_v36 }
 0x105   :  { %391 = vpow2.f32 %v258_v51 }
 0x106   :  { %393 = vpow2.f32 %v264_v60 }
 0x107   :  { %395 = vpow2.f32 %v260_v1 }
 0x10a   :  { %v382_v37 = vpop.eup %381 }
 0x10b   :  { %v384_v40 = vpop.eup %383  ;;  %v216_v41 = vmul.f32 1.0614054, %v382_v37 }
 0x10c   :  { %v214_v43 = vmul.f32 1.0614054, %v384_v40  ;;  %v386_v46 = vpop.eup %385 }
 0x10d   :  { %v220_v45 = vadd.f32 -1.4531521, %v216_v41  ;;  %v217_v52 = vmul.f32 1.0614054, %v386_v46  ;;  %v388_v53 = vpop.eup %387 }
 0x10e   :  { %v218_v48 = vadd.f32 -1.4531521, %v214_v43  ;;  %v215_v58 = vmul.f32 1.0614054, %v388_v53  ;;  %v390_v24 = vpop.eup %389 }
 0x10f   :  { %v224_v50 = vmul.f32 %v382_v37, %v220_v45  ;;  %v221_v57 = vadd.f32 -1.4531521, %v217_v52  ;;  %v392_v26 = vpop.eup %391  ;;  %v185_v52 = vmul.f32 0.5, %v458_v17 }
 0x110   :  { %v222_v54 = vmul.f32 %v384_v40, %v218_v48  ;;  %v219_v63 = vadd.f32 -1.4531521, %v215_v58  ;;  %v394_v35 = vpop.eup %393 }
 0x111   :  { %v228_v56 = vadd.f32 1.4214138, %v224_v50  ;;  %v225_v62 = vmul.f32 %v386_v46, %v221_v57  ;;  %v396_v42 = vpop.eup %395  ;;  %v195_v50 = vsel %vm191_vm3, 1.0, %v397_v36  ;;  %v183_v57 = vmul.f32 0.5, %v467_v22 }
 0x112   :  { %v226_v59 = vadd.f32 1.4214138, %v222_v54  ;;  %v223_v4 = vmul.f32 %v388_v53, %v219_v63 }
 0x113   :  { %v232_v61 = vmul.f32 %v382_v37, %v228_v56  ;;  %v229_v3 = vadd.f32 1.4214138, %v225_v62 }
 0x114   :  { %v230_v0 = vmul.f32 %v384_v40, %v226_v59  ;;  %v227_v8 = vadd.f32 1.4214138, %v223_v4 }
 0x115   :  { %v236_v2 = vadd.f32 -0.28449672, %v232_v61  ;;  %v233_v7 = vmul.f32 %v386_v46, %v229_v3 }
 0x116   :  { %v234_v5 = vadd.f32 -0.28449672, %v230_v0  ;;  %v231_v13 = vmul.f32 %v388_v53, %v227_v8 }
 0x117   :  { %v240_v6 = vmul.f32 %v382_v37, %v236_v2  ;;  %v237_v11 = vadd.f32 -0.28449672, %v233_v7 }
 0x118   :  { %v238_v9 = vmul.f32 %v384_v40, %v234_v5  ;;  %v235_v23 = vadd.f32 -0.28449672, %v231_v13 }
 0x119   :  { %v244_v10 = vadd.f32 0.2548296, %v240_v6  ;;  %v241_v20 = vmul.f32 %v386_v46, %v237_v11 }
 0x11a   :  { %v242_v15 = vadd.f32 0.2548296, %v238_v9  ;;  %v239_v30 = vmul.f32 %v388_v53, %v235_v23 }
 0x11b   :  { %v248_v18 = vmul.f32 %v382_v37, %v244_v10  ;;  %v245_v29 = vadd.f32 0.2548296, %v241_v20 }
 0x11c   :  { %v246_v25 = vmul.f32 %v384_v40, %v242_v15  ;;  %v243_v34 = vadd.f32 0.2548296, %v239_v30 }
 0x11d   :  { %v268_v27 = vmul.f32 %v390_v24, %v248_v18  ;;  %v249_v33 = vmul.f32 %v386_v46, %v245_v29 }
 0x11e   :  { %v266_v31 = vmul.f32 %v392_v26, %v246_v25  ;;  %v247_v41 = vmul.f32 %v388_v53, %v243_v34  ;;  %v182_v53 = vmul.f32 0.5, %v453_v14 }
 0x11f   :  { %v272_v32 = vsub.f32 1.0, %v268_v27  ;;  %v269_v40 = vmul.f32 %v394_v35, %v249_v33 }
 0x120   :  { %v270_v37 = vsub.f32 1.0, %v266_v31  ;;  %v267_v45 = vmul.f32 %v396_v42, %v247_v41 }
 0x121   :  { %v276_v39 = vmul.f32 %v272_v32, %v196_v38  ;;  %v273_v44 = vsub.f32 1.0, %v269_v40 }
 0x122   :  { %v274_v43 = vmul.f32 %v270_v37, %v194_v16  ;;  %v271_v48 = vsub.f32 1.0, %v267_v45 }
 0x123   :  { %v280_v19 = vadd.f32 1.0, %v276_v39  ;;  %v277_v46 = vmul.f32 %v273_v44, %v197_v47 }
 0x124   :  { %v278_v51 = vadd.f32 1.0, %v274_v43  ;;  %v275_v54 = vmul.f32 %v271_v48, %v195_v50 }
 0x125   :  { %v281_v21 = vadd.f32 1.0, %v277_v46  ;;  %v284_v55 = vmul.f32 %v280_v19, %v184_v49 }
 0x126   :  { %v279_v28 = vadd.f32 1.0, %v275_v54  ;;  %v282_v58 = vmul.f32 %v278_v51, %v182_v53 }
 0x127   :  { %v285_v56 = vmul.f32 %v281_v21, %v185_v52 }
 0x128   :  { %v283_v60 = vmul.f32 %v279_v28, %v183_v57 }
 0x129   :  { %v337_v59 = vpack.c.bf16 %v285_v56, %v284_v55 }
 0x12a   :  { %v332_v12 = vpack.c.bf16 %v283_v60, %v282_v58 }
 0x12b   :  { %339 = vst [vmem:[%s492_s3 + $0x8] sm:$0xff] %v337_v59  }
 0x12c   :  { %333 = vst [vmem:[%s492_s3] sm:$0xff] %v332_v12  }

// kernel: _forward.4
= control target key start
LH: loop header
LB: loop body
LE: loop exit
PB: predicated region body
PF: predicated region fallthrough
CT: control target
= control target key end

     0   :  { %s1111_s21 = smov 0   ;;  %s1113_s22 = smov 0   ;;  %s1210_s0 = inlined_call_operand.vmem [shape: bf16[2,16,128], index: 0, kind: input, shape index: {}]   ;;  %s1211_s1 = inlined_call_operand.vmem [shape: bf16[128,128], index: 1, kind: input, shape index: {}]   ;;  %s1212_s2 = inlined_call_operand.vmem [shape: f32[1,128], index: 2, kind: input, shape index: {}]   ;;  %s1213_s3 = inlined_call_operand.vmem [shape: bf16[128,8], index: 3, kind: input, shape index: {}]   ;;  %s1214_s4 = inlined_call_operand.vmem [shape: f32[1,8], index: 4, kind: input, shape index: {}]   ;;  %s1215_s5 = inlined_call_operand.vmem [shape: bf16[2,8,16], index: 5, kind: output, shape index: {0}]   ;;  %s1216_s6 = inlined_call_operand.vmem [shape: f32[2,1,128], index: 6, kind: output, shape index: {1}]  }
   0x1   :  { %s1115_s23 = smov 0  }
   0x2 LB: > { %s36_s24 = sadd.s32 1, %s1067_s22  ;;  %p913_p0 = scmp.ge.s32.totalorder %s1071_s23, 1  ;;  %s1071_s23 = sphi %s1115_s23, %s17_s23   ;;  %s1067_s22 = sphi %s1113_s22, %s1218_s22   ;;  %s1063_s21 = sphi %s1111_s21, %s1217_s21  }
   0x3   : > { %p38_p1 = scmp.ge.s32.totalorder %s36_s24, 2  ;;  %p275_p2 = scmp.lt.s32.totalorder %s1071_s23, 3 }
   0x5   : > { %s1220_s24 = smov (%p38_p1, %s36_s24), 0  ;;  %p276_p3 = pnand %p913_p0, %p275_p2 }
   0x6   : > { %v1024_v0 = vld [vmem:[%s1211_s1] sm:$0xff] (!%p276_p3)   ;;  %v1073_v1 = vmov (!%p276_p3), 0.0   ;;  %v1025_v2 = vld [vmem:[%s1211_s1 + $0x8] sm:$0xff] (!%p276_p3)   ;;  %vm1074_vm0 = vmmov (!%p276_p3), 0   ;;  %p333_p4 = scmp.lt.s32.totalorder (!%p276_p3), %s1063_s21, 1  ;;  %v1026_v3 = vld [vmem:[%s1211_s1 + $0x10] sm:$0xff] (!%p276_p3)  }
   0x7   : > { %279 = sbr.rel (%p276_p3) target bundleno = 660 (0x294), region = 40  ;;  %957 = vmatprep.subr.bf16.mxu0 (!%p276_p3), %v1073_v1  ;;  %977 = vmatprep.subr.bf16.mxu1 (!%p276_p3), %v1073_v1  ;;  %v1027_v4 = vld [vmem:[%s1211_s1 + $0x18] sm:$0xff] (!%p276_p3)   ;;  %v1028_v5 = vld [vmem:[%s1211_s1 + $0x20] sm:$0xff] (!%p276_p3)   ;;  %v1029_v6 = vld [vmem:[%s1211_s1 + $0x28] sm:$0xff] (!%p276_p3)   ;;  %vm571_vm1 = vcmask (!%p276_p3), 64512   ;;  %v1075_v63 = vmov (!%p276_p3), -1.0  }
   0x8   : > { %958 = vmatpush3.bf16.msra.mxu0 (!%p276_p3), %v1024_v0  ;;  %973 = vmatprep.mubr.msk.bf16.mxu0 (!%p276_p3), %vm1074_vm0, %v1073_v1  ;;  %v1030_v7 = vld [vmem:[%s1211_s1 + $0x30] sm:$0xff] (!%p276_p3)   ;;  %v1031_v8 = vld [vmem:[%s1211_s1 + $0x38] sm:$0xff] (!%p276_p3)   ;;  %v1033_v10 = vld [vmem:[%s1213_s3] sm:$0xff] (!%p276_p3)   ;;  %572 = vst.msk [vmem:[#allocation2] sm:$0xff] (!%p276_p3), %vm571_vm1, %v1073_v1  ;;  %vm736_vm4 = vcmask (!%p276_p3), 125952  }
   0x9   : > { %959 = vmatprep.subr.bf16.mxu0 (!%p276_p3), %v1073_v1  ;;  %993 = vmatprep.mubr.msk.bf16.mxu1 (!%p276_p3), %vm1074_vm0, %v1073_v1  ;;  %v1034_v11 = vld [vmem:[%s1213_s3 + $0x8] sm:$0xff] (!%p276_p3)   ;;  %v1035_v12 = vld [vmem:[%s1213_s3 + $0x10] sm:$0xff] (!%p276_p3)   ;;  %v1036_v13 = vld [vmem:[%s1213_s3 + $0x18] sm:$0xff] (!%p276_p3)   ;;  %573 = vst.msk [vmem:[#allocation2 + $0x8] sm:$0xff] (!%p276_p3), %vm571_vm1, %v1073_v1 }
   0xa   : > { %978 = vmatpush3.bf16.msra.mxu1 (!%p276_p3), %v1033_v10  ;;  %v1037_v14 = vld [vmem:[%s1213_s3 + $0x20] sm:$0xff] (!%p276_p3)   ;;  %v1038_v15 = vld [vmem:[%s1213_s3 + $0x28] sm:$0xff] (!%p276_p3)   ;;  %v1039_v16 = vld [vmem:[%s1213_s3 + $0x30] sm:$0xff] (!%p276_p3)  }
   0xb   : > { %979 = vmatprep.subr.bf16.mxu1 (!%p276_p3), %v1073_v1  ;;  %v1040_v17 = vld [vmem:[%s1213_s3 + $0x38] sm:$0xff] (!%p276_p3)   ;;  %v917_v18 = vld [vmem:[%s1212_s2] ss:$0 sm:$0xff] (!%p276_p3) }
   0xc   : > { %960 = vmatpush3.bf16.msra.mxu0 (!%p276_p3), %v1025_v2 }
   0xd   : > { %961 = vmatprep.subr.bf16.mxu0 (!%p276_p3), %v1073_v1 }
   0xe   : > { %s1222_s21 = smov (!%p333_p4, %s1063_s21), 1  ;;  %980 = vmatpush3.bf16.msra.mxu1 %v1034_v11 }
   0xf   : > { %s938_s7 = sshll.u32 %s1222_s21, 3  ;;  %981 = vmatprep.subr.bf16.mxu1 %v1073_v1  ;;  %s370_s25 = scalar_lea.vmem %s1216_s6, %s1222_s21 }
  0x10   : > { %s340_s10 = scalar_lea.vmem %s1210_s0, %s938_s7  ;;  %962 = vmatpush3.bf16.msra.mxu0 %v1026_v3  ;;  %s916_s28 = sshll.u32 %s1222_s21, 2 }
  0x11   : > { %963 = vmatprep.subr.bf16.mxu0 %v1073_v1  ;;  %v1032_v9 = vld [vmem:[%s340_s10] sm:$0xff]   ;;  %s361_s7 = scalar_lea.vmem %s1215_s5, %s916_s28 }
  0x12   : > { %982 = vmatpush3.bf16.msra.mxu1 %v1035_v12 }
  0x13   : > { %983 = vmatprep.subr.bf16.mxu1 %v1073_v1 }
  0x14   : > { %964 = vmatpush3.bf16.msra.mxu0 %v1027_v4 }
  0x15   : > { %965 = vmatprep.subr.bf16.mxu0 %v1073_v1 }
  0x16   : > { %984 = vmatpush3.bf16.msra.mxu1 %v1036_v13 }
  0x17   : > { %985 = vmatprep.subr.bf16.mxu1 %v1073_v1 }
  0x18   : > { %966 = vmatpush3.bf16.msra.mxu0 %v1028_v5 }
  0x19   : > { %967 = vmatprep.subr.bf16.mxu0 %v1073_v1 }
  0x1a   : > { %986 = vmatpush3.bf16.msra.mxu1 %v1037_v14 }
  0x1b   : > { %987 = vmatprep.subr.bf16.mxu1 %v1073_v1 }
  0x1c   : > { %968 = vmatpush3.bf16.msra.mxu0 %v1029_v6 }
  0x1d   : > { %969 = vmatprep.subr.bf16.mxu0 %v1073_v1 }
  0x1e   : > { %988 = vmatpush3.bf16.msra.mxu1 %v1038_v15 }
  0x1f   : > { %989 = vmatprep.subr.bf16.mxu1 %v1073_v1 }
  0x20   : > { %970 = vmatpush3.bf16.msra.mxu0 %v1030_v7 }
  0x21   : > { %971 = vmatprep.subr.bf16.mxu0 %v1073_v1 }
  0x22   : > { %990 = vmatpush3.bf16.msra.mxu1 %v1039_v16 }
  0x23   : > { %991 = vmatprep.subr.bf16.mxu1 %v1073_v1 }
  0x24   : > { %972 = vmatpush3.bf16.msra.mxu0 %v1031_v8 }
  0x26   : > { %992 = vmatpush3.bf16.msra.mxu1 %v1040_v17 }
  0x27   : > { %974 = vmatmul.mubr.bf16.vlgmr.msra.gmra.mrb[0].mxu0 %v1032_v9 }
  0xfa   : > { %v485_v19 = vpop.f32.mrb[0].mxu0 }
  0xfb   : > { %v486_v20 = vadd.f32 %v917_v18, %v485_v19  ;;  %v975_v21 = vpop.f32.mrb[1].mxu0 }
  0xfc   : > { %v488_v22 = vpop.f32.mrb[2].mxu0  ;;  %v574_v21 = vld [vmem:[#allocation2] sm:$0xff] }
  0xfd   : > { %v494_v23 = vmul.f32 0.70710677, %v486_v20  ;;  %v489_v24 = vadd.f32 %v917_v18, %v488_v22  ;;  %v976_v25 = vpop.f32.mrb[3].mxu0  ;;  %v492_v7 = vmul.f32 0.5, %v486_v20  ;;  %v575_v22 = vld [vmem:[#allocation2 + $0x8] sm:$0xff] }
  0xff   : > { %v500_v26 = vand.u32 2147483647, %v494_v23  ;;  %v495_v27 = vmul.f32 0.70710677, %v489_v24  ;;  %vm496_vm2 = vcmp.ge.f32.partialorder %v494_v23, 0.0  ;;  %v493_v8 = vmul.f32 0.5, %v489_v24 }
 0x100   : > { %v498_v0 = vsel %vm496_vm2, 1.0, %v1075_v63 }
 0x101   : > { %v502_v28 = vmul.f32 0.3275911, %v500_v26  ;;  %v501_v29 = vand.u32 2147483647, %v495_v27  ;;  %v526_v33 = vsub.f32 0.0, %v500_v26  ;;  %vm497_vm3 = vcmp.ge.f32.partialorder %v495_v27, 0.0 }
 0x102   : > { %v499_v4 = vsel %vm497_vm3, 1.0, %v1075_v63 }
 0x103   : > { %v504_v30 = vadd.f32 1.0, %v502_v28  ;;  %v503_v31 = vmul.f32 0.3275911, %v501_v29  ;;  %v527_v34 = vsub.f32 0.0, %v501_v29  ;;  %v528_v36 = vmul.f32 %v526_v33, %v500_v26  ;;  %v935_v28 = vld [vmem:[%s1214_s4] ss:$0 sm:$0xff] }
 0x105   : > { %1041 = vrcp.f32 %v504_v30  ;;  %v505_v32 = vadd.f32 1.0, %v503_v31  ;;  %v529_v40 = vmul.f32 %v527_v34, %v501_v29  ;;  %v530_v41 = vmul.f32 1.442695, %v528_v36 }
 0x107   : > { %1043 = vrcp.f32 %v505_v32  ;;  %v532_v46 = vmul.f32 1.442695, %v529_v40 }
 0x108   : > { %1045 = vpow2.f32 %v530_v41 }
 0x109   : > { %1047 = vpow2.f32 %v532_v46 }
 0x10f   : > { %v1042_v35 = vpop.eup %1041 }
 0x110   : > { %v508_v37 = vmul.f32 1.0614054, %v1042_v35 }
 0x111   : > { %v1044_v38 = vpop.eup %1043 }
 0x112   : > { %v510_v39 = vadd.f32 -1.4531521, %v508_v37  ;;  %v509_v42 = vmul.f32 1.0614054, %v1044_v38  ;;  %v1046_v57 = vpop.eup %1045 }
 0x113   : > { %v1048_v61 = vpop.eup %1047 }
 0x114   : > { %v512_v43 = vmul.f32 %v1042_v35, %v510_v39  ;;  %v511_v44 = vadd.f32 -1.4531521, %v509_v42 }
 0x116   : > { %v514_v45 = vadd.f32 1.4214138, %v512_v43  ;;  %v513_v47 = vmul.f32 %v1044_v38, %v511_v44 }
 0x118   : > { %v516_v48 = vmul.f32 %v1042_v35, %v514_v45  ;;  %v515_v49 = vadd.f32 1.4214138, %v513_v47 }
 0x11a   : > { %v518_v50 = vadd.f32 -0.28449672, %v516_v48  ;;  %v517_v51 = vmul.f32 %v1044_v38, %v515_v49 }
 0x11c   : > { %v520_v52 = vmul.f32 %v1042_v35, %v518_v50  ;;  %v519_v53 = vadd.f32 -0.28449672, %v517_v51 }
 0x11e   : > { %v522_v54 = vadd.f32 0.2548296, %v520_v52  ;;  %v521_v55 = vmul.f32 %v1044_v38, %v519_v53 }
 0x120   : > { %v524_v56 = vmul.f32 %v1042_v35, %v522_v54  ;;  %v523_v58 = vadd.f32 0.2548296, %v521_v55 }
 0x122   : > { %v534_v59 = vmul.f32 %v1046_v57, %v524_v56  ;;  %v525_v60 = vmul.f32 %v1044_v38, %v523_v58 }
 0x124   : > { %v536_v62 = vsub.f32 1.0, %v534_v59  ;;  %v535_v1 = vmul.f32 %v1048_v61, %v525_v60 }
 0x126   : > { %v538_v2 = vmul.f32 %v536_v62, %v498_v0  ;;  %v537_v3 = vsub.f32 1.0, %v535_v1 }
 0x128   : > { %v540_v5 = vadd.f32 1.0, %v538_v2  ;;  %v539_v6 = vmul.f32 %v537_v3, %v499_v4 }
 0x12a   : > { %v541_v9 = vadd.f32 1.0, %v539_v6  ;;  %v542_v10 = vmul.f32 %v540_v5, %v492_v7 }
 0x12c   : > { %v543_v11 = vmul.f32 %v541_v9, %v493_v8 }
 0x12e   : > { %v559_v12 = vadd.f32 %v543_v11, %v542_v10  ;;  %v576_v13 = vpack.c.bf16 %v543_v11, %v542_v10 }
 0x130   : > { %v560_v14 = vrot.slane %v559_v12, 4  ;;  %994 = vmatmul.mubr.bf16.vlgmr.msra.gmra.mrb[0].mxu1 %v576_v13 }
 0x132   : > { %v561_v15 = vadd.f32 %v560_v14, %v559_v12 }
 0x134   : > { %v562_v16 = vrot.slane %v561_v15, 2 }
 0x136   : > { %v563_v17 = vadd.f32 %v562_v16, %v561_v15 }
 0x138   : > { %v564_v18 = vrot.slane %v563_v17, 1 }
 0x13a   : > { %v565_v19 = vadd.f32 %v564_v18, %v563_v17 }
 0x13c   : > { %566 = vst [vmem:[%s370_s25] sm:$0x1] %v565_v19 }
 0x203   : > { %v675_v20 = vpop.f32.mrb[0].mxu1 }
 0x204   : > { %v682_v23 = vadd.f32 %v675_v20, %v574_v21  ;;  %v995_v24 = vpop.f32.mrb[1].mxu1 }
 0x205   : > { %v678_v25 = vpop.f32.mrb[2].mxu1 }
 0x206   : > { %685 = vst.msk [vmem:[#allocation2] sm:$0xff] %vm571_vm1, %v682_v23  ;;  %v683_v26 = vadd.f32 %v678_v25, %v575_v22  ;;  %v996_v27 = vpop.f32.mrb[3].mxu1 }
 0x208   : > { %686 = vst.msk [vmem:[#allocation2 + $0x8] sm:$0xff] %vm571_vm1, %v683_v26 }
 0x20d   : > { %v690_v29 = vld [vmem:[#allocation2] sm:$0xff] }
 0x20e   : > { %v699_v30 = vadd.f32 %v935_v28, %v690_v29 }
 0x20f   : > { %v691_v31 = vld [vmem:[#allocation2 + $0x8] sm:$0xff] }
 0x210   : > { %703 = vxpose.xlu0.b32.start [1/2] (short) (narrow) %v699_v30, 8  ;;  %v700_v32 = vadd.f32 %v935_v28, %v691_v31 }
 0x214   : > { %704 = vxpose.xlu0.b32.end [2/2] (short) (narrow) %v700_v32, 8 }
 0x290   : > { %v719_v33 = vpop.trf.xlu0 }
 0x291   : > { %v735_v34 = vpack.c.bf16 %v719_v33, %v719_v33 }
 0x293   : > { %737 = vst.msk [vmem:[%s361_s7] sm:$0xf] %vm736_vm4, %v735_v34 }
 0x294 PF: > { %s17_s23 = sadd.s32 1, %s1071_s23   ;;  %s1217_s21 = smov %s1067_s22 }
 0x295   : > { %p14_p5 = scmp.ge.s32.totalorder %s17_s23, 4   ;;  %s1218_s22 = smov %s1220_s24 }
 0x297   :  { %16 = sbr.rel (!%p14_p5) target bundleno = 2 (0x2), region = 99 }

// kernel: _forward.5
= control target key start
LH: loop header
LB: loop body
LE: loop exit
PB: predicated region body
PF: predicated region fallthrough
CT: control target
= control target key end

     0   :  { %s1445_s12 = smov 0   ;;  %s1447_s13 = smov 0   ;;  %s1623_s0 = inlined_call_operand.vmem [shape: bf16[16,4], index: 0, kind: input, shape index: {}]   ;;  %s1624_s1 = inlined_call_operand.vmem [shape: bf16[2,8,4,4], index: 1, kind: input, shape index: {}]   ;;  %s1625_s2 = inlined_call_operand.vmem [shape: bf16[4,16], index: 2, kind: input, shape index: {}]   ;;  %s1626_s3 = inlined_call_operand.vmem [shape: f32[2,8,16,16], index: 3, kind: output, shape index: {}]  }
   0x1   :  { %s1449_s14 = smov 0  }
   0x2 LB: > { %s32_s15 = sadd.s32 1, %s1417_s13  ;;  %p1197_p0 = scmp.ge.s32.totalorder %s1421_s14, 1  ;;  %s1421_s14 = sphi %s1449_s14, %s13_s14   ;;  %s1417_s13 = sphi %s1447_s13, %s1628_s13   ;;  %s1413_s12 = sphi %s1445_s12, %s1627_s12  }
   0x3   : > { %p34_p1 = scmp.ge.s32.totalorder %s32_s15, 2  ;;  %p178_p2 = scmp.lt.s32.totalorder %s1421_s14, 3 }
   0x5   : > { %s1630_s15 = smov (%p34_p1, %s32_s15), 0  ;;  %p179_p3 = pnand %p1197_p0, %p178_p2 }
   0x6   : > { %v257_v0 = vld [vmem:[%s1625_s2] sm:$0x3] (!%p179_p3)  ;;  %vm263_vm0 = vcmask (!%p179_p3), 1041408   ;;  %p227_p4 = scmp.lt.s32.totalorder (!%p179_p3), %s1413_s12, 1  ;;  %v1423_v1 = vmov (!%p179_p3), 0.0   ;;  %vm1424_vm1 = vmmov (!%p179_p3), 0  }
   0x7   : > { %182 = sbr.rel (%p179_p3) target bundleno = 488 (0x1e8), region = 32  ;;  %1276 = vmatprep.subr.bf16.mxu0 (!%p179_p3), %v1423_v1  ;;  %1282 = vmatprep.subr.bf16.mxu1 (!%p179_p3), %v1423_v1  ;;  %v265_v2 = vsel (!%p179_p3), %vm263_vm0, %v257_v0, 0  ;;  %vm259_vm2 = vcmask (!%p179_p3), 31744   ;;  %vm308_vm3 = vcmask (!%p179_p3), 123904   ;;  %vm359_vm4 = vcmask (!%p179_p3), 125954   ;;  %v1527_v36 = vld [vmem:[%s1623_s0] sm:$0xff] (!%p179_p3)  }
   0x8   : > { %1277 = vmatpush3.bf16.msra.mxu0 (!%p179_p3), %v265_v2  ;;  %1283 = vmatpush3.bf16.msra.mxu1 (!%p179_p3), %v265_v2  ;;  %vm410_vm5 = vcmask (!%p179_p3), 128004   ;;  %vm461_vm6 = vcmask (!%p179_p3), 130054   ;;  %vm717_vm7 = vcmask (!%p179_p3), 130048  }
   0x9   : > { %1278 = vmatprep.mubr.msk.bf16.mxu0 (!%p179_p3), %vm1424_vm1, %v1423_v1  ;;  %1284 = vmatprep.mubr.msk.bf16.mxu1 (!%p179_p3), %vm1424_vm1, %v1423_v1 }
   0xa   : > { %1288 = vmatprep.subr.bf16.mxu0 (!%p179_p3), %v1423_v1  ;;  %1294 = vmatprep.subr.bf16.mxu1 (!%p179_p3), %v1423_v1 }
   0xe   : > { %s1632_s12 = smov (!%p227_p4, %s1413_s12), 1 }
   0xf   : > { %s1242_s18 = sshll.u32 %s1632_s12, 4  ;;  %s1243_s24 = sshll.u32 %s1632_s12, 7 }
  0x10   : > { %s1481_s21 = scalar_lea.vmem %s1624_s1, %s1242_s18  ;;  %s1580_s27 = scalar_lea.vmem %s1626_s3, %s1243_s24 }
  0x11   : > { %v258_v3 = vld [vmem:[%s1481_s21] sm:$0x3]  ;;  %v1203_v4 = vld [vmem:[%s1481_s21 + $0x2] sm:$0x3]  ;;  %v1205_v5 = vld [vmem:[%s1481_s21 + $0x4] sm:$0x3] }
  0x12   : > { %1279 = vmatmul.mubr.msk.bf16.vlgmr.msra.gmra.mrb[0].mxu0 %vm259_vm2, %v258_v3  ;;  %1285 = vmatmul.mubr.msk.bf16.vlgmr.msra.gmra.mrb[0].mxu1 %vm259_vm2, %v1203_v4  ;;  %v1207_v6 = vld [vmem:[%s1481_s21 + $0x6] sm:$0x3]  ;;  %v1209_v7 = vld [vmem:[%s1481_s21 + $0x8] sm:$0x3]  ;;  %v1211_v8 = vld [vmem:[%s1481_s21 + $0xa] sm:$0x3] }
  0x13   : > { %1289 = vmatpush3.bf16.msra.mxu0 %v265_v2  ;;  %1295 = vmatpush3.bf16.msra.mxu1 %v265_v2  ;;  %v1213_v9 = vld [vmem:[%s1481_s21 + $0xc] sm:$0x3]  ;;  %v1215_v10 = vld [vmem:[%s1481_s21 + $0xe] sm:$0x3] }
  0x14   : > { %1290 = vmatprep.mubr.msk.bf16.mxu0 %vm1424_vm1, %v1423_v1  ;;  %1296 = vmatprep.mubr.msk.bf16.mxu1 %vm1424_vm1, %v1423_v1 }
  0x15   : > { %1300 = vmatprep.subr.bf16.mxu0 %v1423_v1  ;;  %1306 = vmatprep.subr.bf16.mxu1 %v1423_v1 }
  0x1a   : > { %1291 = vmatmul.mubr.msk.bf16.vlgmr.msra.gmra.mrb[4].mxu0 %vm259_vm2, %v1205_v5  ;;  %1297 = vmatmul.mubr.msk.bf16.vlgmr.msra.gmra.mrb[4].mxu1 %vm259_vm2, %v1207_v6 }
  0x1b   : > { %1301 = vmatpush3.bf16.msra.mxu0 %v265_v2  ;;  %1307 = vmatpush3.bf16.msra.mxu1 %v265_v2 }
  0x1c   : > { %1302 = vmatprep.mubr.msk.bf16.mxu0 %vm1424_vm1, %v1423_v1  ;;  %1308 = vmatprep.mubr.msk.bf16.mxu1 %vm1424_vm1, %v1423_v1 }
  0x1d   : > { %1312 = vmatprep.subr.bf16.mxu0 %v1423_v1  ;;  %1318 = vmatprep.subr.bf16.mxu1 %v1423_v1 }
  0x22   : > { %1303 = vmatmul.mubr.msk.bf16.vlgmr.msra.gmra.mrb[8].mxu0 %vm259_vm2, %v1209_v7  ;;  %1309 = vmatmul.mubr.msk.bf16.vlgmr.msra.gmra.mrb[8].mxu1 %vm259_vm2, %v1211_v8 }
  0x23   : > { %1313 = vmatpush3.bf16.msra.mxu0 %v265_v2  ;;  %1319 = vmatpush3.bf16.msra.mxu1 %v265_v2 }
  0x24   : > { %1314 = vmatprep.mubr.msk.bf16.mxu0 %vm1424_vm1, %v1423_v1  ;;  %1320 = vmatprep.mubr.msk.bf16.mxu1 %vm1424_vm1, %v1423_v1 }
  0x25   : > { %1324 = vmatprep.subr.bf16.mxu0 %v1423_v1  ;;  %1330 = vmatprep.subr.bf16.mxu1 %v1423_v1 }
  0x2a   : > { %1315 = vmatmul.mubr.msk.bf16.vlgmr.msra.gmra.mrb[12].mxu0 %vm259_vm2, %v1213_v9  ;;  %1321 = vmatmul.mubr.msk.bf16.vlgmr.msra.gmra.mrb[12].mxu1 %vm259_vm2, %v1215_v10 }
  0x2b   : > { %1326 = vmatprep.mubr.msk.bf16.mxu0 %vm1424_vm1, %v1423_v1  ;;  %1332 = vmatprep.mubr.msk.bf16.mxu1 %vm1424_vm1, %v1423_v1 }
  0xe5   : > { %v301_v11 = vpop.f32.mrb[0].mxu0  ;;  %v349_v12 = vpop.f32.mrb[0].mxu1 }
  0xe6   : > { %v307_v13 = vpack.c.bf16 %v301_v11, %v301_v11  ;;  %v355_v14 = vpack.c.bf16 %v349_v12, %v349_v12  ;;  %v1280_v15 = vpop.f32.mrb[1].mxu0  ;;  %v1286_v16 = vpop.f32.mrb[1].mxu1 }
  0xe7   : > { %v304_v17 = vpop.f32.mrb[2].mxu0  ;;  %v352_v18 = vpop.f32.mrb[2].mxu1 }
  0xe8   : > { %309 = vst.msk [vmem:[#allocation2] sm:$0x3] %vm308_vm3, %v307_v13  ;;  %v357_v19 = vrot.slane %v355_v14, 6  ;;  %v1281_v20 = vpop.f32.mrb[3].mxu0  ;;  %v1287_v21 = vpop.f32.mrb[3].mxu1 }
  0xea   : > { %360 = vst.msk [vmem:[#allocation2] sm:$0xc] %vm359_vm4, %v357_v19 }
  0xed   : > { %v400_v22 = vpop.f32.mrb[4].mxu0  ;;  %v451_v23 = vpop.f32.mrb[4].mxu1 }
  0xee   : > { %v406_v24 = vpack.c.bf16 %v400_v22, %v400_v22  ;;  %v457_v25 = vpack.c.bf16 %v451_v23, %v451_v23  ;;  %v1292_v26 = vpop.f32.mrb[5].mxu0  ;;  %v1298_v27 = vpop.f32.mrb[5].mxu1 }
  0xef   : > { %v403_v28 = vpop.f32.mrb[6].mxu0  ;;  %v454_v29 = vpop.f32.mrb[6].mxu1  ;;  %v662_v30 = vld [vmem:[#allocation2] sm:$0x3] }
  0xf0   : > { %v408_v31 = vrot.slane %v406_v24, 4  ;;  %v459_v32 = vrot.slane %v457_v25, 2  ;;  %v1293_v33 = vpop.f32.mrb[7].mxu0  ;;  %v1299_v34 = vpop.f32.mrb[7].mxu1  ;;  %v674_v35 = vsel %vm263_vm0, %v662_v30, 0 }
  0xf1   : > { %1325 = vmatpush3.bf16.msra.mxu0 %v674_v35  ;;  %v720_v37 = vld [vmem:[#allocation2] sm:$0xc] }
  0xf2   : > { %411 = vst.msk [vmem:[#allocation2] sm:$0x30] %vm410_vm5, %v408_v31  ;;  %v722_v38 = vrot.slane %v720_v37, 2  ;;  %1336 = vmatprep.subr.bf16.mxu0 %v1423_v1 }
  0xf3   : > { %462 = vst.msk [vmem:[#allocation2] sm:$0xc0] %vm461_vm6, %v459_v32 }
  0xf4   : > { %v724_v39 = vsel %vm263_vm0, %v722_v38, 0  ;;  %1327 = vmatmul.mubr.msk.bf16.vlgmr.msra.gmra.mrb[16].mxu0 %vm259_vm2, %v1527_v36 }
  0xf5   : > { %v502_v40 = vpop.f32.mrb[8].mxu0  ;;  %v549_v41 = vpop.f32.mrb[8].mxu1  ;;  %1331 = vmatpush3.bf16.msra.mxu1 %v724_v39  ;;  %1338 = vmatprep.mubr.msk.bf16.mxu0 %vm1424_vm1, %v1423_v1 }
  0xf6   : > { %v508_v42 = vpack.c.bf16 %v502_v40, %v502_v40  ;;  %v555_v43 = vpack.c.bf16 %v549_v41, %v549_v41  ;;  %v1304_v44 = vpop.f32.mrb[9].mxu0  ;;  %v1310_v45 = vpop.f32.mrb[9].mxu1  ;;  %1342 = vmatprep.subr.bf16.mxu1 %v1423_v1 }
  0xf7   : > { %v505_v46 = vpop.f32.mrb[10].mxu0  ;;  %v552_v47 = vpop.f32.mrb[10].mxu1 }
  0xf8   : > { %509 = vst.msk [vmem:[#allocation2 + $0x8] sm:$0x3] %vm308_vm3, %v508_v42  ;;  %v557_v48 = vrot.slane %v555_v43, 6  ;;  %v1305_v49 = vpop.f32.mrb[11].mxu0  ;;  %v1311_v50 = vpop.f32.mrb[11].mxu1  ;;  %1333 = vmatmul.mubr.msk.bf16.vlgmr.msra.gmra.mrb[16].mxu1 %vm259_vm2, %v1527_v36 }
  0xf9   : > { %v770_v51 = vld [vmem:[#allocation2] sm:$0x30]  ;;  %1344 = vmatprep.mubr.msk.bf16.mxu1 %vm1424_vm1, %v1423_v1 }
  0xfa   : > { %v820_v52 = vld [vmem:[#allocation2] sm:$0xc0]  ;;  %559 = vst.msk [vmem:[#allocation2 + $0x8] sm:$0xc] %vm359_vm4, %v557_v48  ;;  %v772_v53 = vrot.slane %v770_v51, 4 }
  0xfb   : > { %v822_v54 = vrot.slane %v820_v52, 6 }
  0xfc   : > { %v774_v55 = vsel %vm263_vm0, %v772_v53, 0 }
  0xfd   : > { %v824_v56 = vsel %vm263_vm0, %v822_v54, 0  ;;  %v599_v57 = vpop.f32.mrb[12].mxu0  ;;  %v649_v58 = vpop.f32.mrb[12].mxu1  ;;  %1337 = vmatpush3.bf16.msra.mxu0 %v774_v55 }
  0xfe   : > { %1343 = vmatpush3.bf16.msra.mxu1 %v824_v56  ;;  %v605_v59 = vpack.c.bf16 %v599_v57, %v599_v57  ;;  %v655_v60 = vpack.c.bf16 %v649_v58, %v649_v58  ;;  %v1316_v61 = vpop.f32.mrb[13].mxu0  ;;  %v1322_v62 = vpop.f32.mrb[13].mxu1  ;;  %1348 = vmatprep.subr.bf16.mxu0 %v1423_v1 }
  0xff   : > { %1354 = vmatprep.subr.bf16.mxu1 %v1423_v1  ;;  %v602_v63 = vpop.f32.mrb[14].mxu0  ;;  %v652_v0 = vpop.f32.mrb[14].mxu1  ;;  %v870_v2 = vld [vmem:[#allocation2 + $0x8] sm:$0x3] }
 0x100   : > { %v607_v3 = vrot.slane %v605_v59, 4  ;;  %v657_v4 = vrot.slane %v655_v60, 2  ;;  %v1317_v5 = vpop.f32.mrb[15].mxu0  ;;  %v1323_v6 = vpop.f32.mrb[15].mxu1  ;;  %1339 = vmatmul.mubr.msk.bf16.vlgmr.msra.gmra.mrb[20].mxu0 %vm259_vm2, %v1527_v36  ;;  %v872_v7 = vsel %vm263_vm0, %v870_v2, 0 }
 0x101   : > { %1345 = vmatmul.mubr.msk.bf16.vlgmr.msra.gmra.mrb[20].mxu1 %vm259_vm2, %v1527_v36  ;;  %1349 = vmatpush3.bf16.msra.mxu0 %v872_v7  ;;  %v918_v8 = vld [vmem:[#allocation2 + $0x8] sm:$0xc] }
 0x102   : > { %1350 = vmatprep.mubr.msk.bf16.mxu0 %vm1424_vm1, %v1423_v1  ;;  %609 = vst.msk [vmem:[#allocation2 + $0x8] sm:$0x30] %vm410_vm5, %v607_v3  ;;  %v920_v9 = vrot.slane %v918_v8, 2  ;;  %1356 = vmatprep.mubr.msk.bf16.mxu1 %vm1424_vm1, %v1423_v1 }
 0x103   : > { %659 = vst.msk [vmem:[#allocation2 + $0x8] sm:$0xc0] %vm461_vm6, %v657_v4  ;;  %1360 = vmatprep.subr.bf16.mxu0 %v1423_v1 }
 0x104   : > { %v922_v10 = vsel %vm263_vm0, %v920_v9, 0 }
 0x105   : > { %1355 = vmatpush3.bf16.msra.mxu1 %v922_v10 }
 0x106   : > { %1366 = vmatprep.subr.bf16.mxu1 %v1423_v1 }
 0x108   : > { %1351 = vmatmul.mubr.msk.bf16.vlgmr.msra.gmra.mrb[24].mxu0 %vm259_vm2, %v1527_v36 }
 0x109   : > { %1357 = vmatmul.mubr.msk.bf16.vlgmr.msra.gmra.mrb[24].mxu1 %vm259_vm2, %v1527_v36  ;;  %v968_v11 = vld [vmem:[#allocation2 + $0x8] sm:$0x30]  ;;  %1362 = vmatprep.mubr.msk.bf16.mxu0 %vm1424_vm1, %v1423_v1 }
 0x10a   : > { %v1018_v12 = vld [vmem:[#allocation2 + $0x8] sm:$0xc0]  ;;  %1368 = vmatprep.mubr.msk.bf16.mxu1 %vm1424_vm1, %v1423_v1  ;;  %v970_v13 = vrot.slane %v968_v11, 4 }
 0x10b   : > { %v1020_v14 = vrot.slane %v1018_v12, 6 }
 0x10c   : > { %v972_v15 = vsel %vm263_vm0, %v970_v13, 0 }
 0x10d   : > { %v1022_v16 = vsel %vm263_vm0, %v1020_v14, 0  ;;  %1361 = vmatpush3.bf16.msra.mxu0 %v972_v15 }
 0x10e   : > { %1367 = vmatpush3.bf16.msra.mxu1 %v1022_v16 }
 0x110   : > { %1363 = vmatmul.mubr.msk.bf16.vlgmr.msra.gmra.mrb[28].mxu0 %vm259_vm2, %v1527_v36 }
 0x111   : > { %1369 = vmatmul.mubr.msk.bf16.vlgmr.msra.gmra.mrb[28].mxu1 %vm259_vm2, %v1527_v36 }
 0x1c7   : > { %v710_v1 = vpop.f32.mrb[16].mxu0 }
 0x1c8   : > { %718 = vst.msk [vmem:[%s1580_s27] sm:$0xff] %vm717_vm7, %v710_v1  ;;  %v1328_v17 = vpop.f32.mrb[17].mxu0 }
 0x1c9   : > { %v713_v18 = vpop.f32.mrb[18].mxu0 }
 0x1ca   : > { %719 = vst.msk [vmem:[%s1580_s27 + $0x8] sm:$0xff] %vm717_vm7, %v713_v18  ;;  %v1329_v19 = vpop.f32.mrb[19].mxu0 }
 0x1cb   : > { %v760_v20 = vpop.f32.mrb[16].mxu1 }
 0x1cc   : > { %1220 = vst.msk [vmem:[%s1580_s27 + $0x10] sm:$0xff] %vm717_vm7, %v760_v20  ;;  %v1334_v21 = vpop.f32.mrb[17].mxu1 }
 0x1cd   : > { %v763_v22 = vpop.f32.mrb[18].mxu1 }
 0x1ce   : > { %1221 = vst.msk [vmem:[%s1580_s27 + $0x18] sm:$0xff] %vm717_vm7, %v763_v22  ;;  %v1335_v23 = vpop.f32.mrb[19].mxu1 }
 0x1d3   : > { %v810_v24 = vpop.f32.mrb[20].mxu0 }
 0x1d4   : > { %v860_v25 = vpop.f32.mrb[20].mxu1  ;;  %1223 = vst.msk [vmem:[%s1580_s27 + $0x20] sm:$0xff] %vm717_vm7, %v810_v24  ;;  %v1340_v26 = vpop.f32.mrb[21].mxu0 }
 0x1d5   : > { %1226 = vst.msk [vmem:[%s1580_s27 + $0x30] sm:$0xff] %vm717_vm7, %v860_v25  ;;  %v1346_v27 = vpop.f32.mrb[21].mxu1  ;;  %v813_v28 = vpop.f32.mrb[22].mxu0 }
 0x1d6   : > { %v863_v29 = vpop.f32.mrb[22].mxu1  ;;  %1224 = vst.msk [vmem:[%s1580_s27 + $0x28] sm:$0xff] %vm717_vm7, %v813_v28  ;;  %v1341_v30 = vpop.f32.mrb[23].mxu0 }
 0x1d7   : > { %1227 = vst.msk [vmem:[%s1580_s27 + $0x38] sm:$0xff] %vm717_vm7, %v863_v29  ;;  %v1347_v31 = vpop.f32.mrb[23].mxu1 }
 0x1db   : > { %v908_v32 = vpop.f32.mrb[24].mxu0 }
 0x1dc   : > { %v958_v33 = vpop.f32.mrb[24].mxu1  ;;  %1229 = vst.msk [vmem:[%s1580_s27 + $0x40] sm:$0xff] %vm717_vm7, %v908_v32  ;;  %v1352_v34 = vpop.f32.mrb[25].mxu0 }
 0x1dd   : > { %1232 = vst.msk [vmem:[%s1580_s27 + $0x50] sm:$0xff] %vm717_vm7, %v958_v33  ;;  %v1358_v35 = vpop.f32.mrb[25].mxu1  ;;  %v911_v36 = vpop.f32.mrb[26].mxu0 }
 0x1de   : > { %v961_v37 = vpop.f32.mrb[26].mxu1  ;;  %1230 = vst.msk [vmem:[%s1580_s27 + $0x48] sm:$0xff] %vm717_vm7, %v911_v36  ;;  %v1353_v38 = vpop.f32.mrb[27].mxu0 }
 0x1df   : > { %1233 = vst.msk [vmem:[%s1580_s27 + $0x58] sm:$0xff] %vm717_vm7, %v961_v37  ;;  %v1359_v39 = vpop.f32.mrb[27].mxu1 }
 0x1e3   : > { %v1008_v40 = vpop.f32.mrb[28].mxu0 }
 0x1e4   : > { %v1058_v41 = vpop.f32.mrb[28].mxu1  ;;  %1235 = vst.msk [vmem:[%s1580_s27 + $0x60] sm:$0xff] %vm717_vm7, %v1008_v40  ;;  %v1364_v42 = vpop.f32.mrb[29].mxu0 }
 0x1e5   : > { %1238 = vst.msk [vmem:[%s1580_s27 + $0x70] sm:$0xff] %vm717_vm7, %v1058_v41  ;;  %v1370_v43 = vpop.f32.mrb[29].mxu1  ;;  %v1011_v44 = vpop.f32.mrb[30].mxu0 }
 0x1e6   : > { %v1061_v45 = vpop.f32.mrb[30].mxu1  ;;  %1236 = vst.msk [vmem:[%s1580_s27 + $0x68] sm:$0xff] %vm717_vm7, %v1011_v44  ;;  %v1365_v46 = vpop.f32.mrb[31].mxu0 }
 0x1e7   : > { %1239 = vst.msk [vmem:[%s1580_s27 + $0x78] sm:$0xff] %vm717_vm7, %v1061_v45  ;;  %v1371_v47 = vpop.f32.mrb[31].mxu1 }
 0x1e8 PF: > { %s13_s14 = sadd.s32 1, %s1421_s14   ;;  %s1627_s12 = smov %s1417_s13 }
 0x1e9   : > { %p10_p5 = scmp.ge.s32.totalorder %s13_s14, 4   ;;  %s1628_s13 = smov %s1630_s15 }
 0x1eb   :  { %12 = sbr.rel (!%p10_p5) target bundleno = 2 (0x2), region = 83 }

</bundles_post_ra>
